<compile_context>
chip_gen: v7x
topology: tpu7x:2x2x1
jax: 0.10.0
libtpu: 0.0.40
codegen_flags: <defaults>
</compile_context>

<pallas_src>
import jax
import jax.numpy as jnp
import numpy as np
from jax.experimental import pallas as pl
from jax.experimental.pallas import tpu as pltpu

# ---------------------------------------------------------------- hyperparams
F_IN = 16          # input_features
HID = 32           # hidden_channels
E_DIM = 8          # edge_dim
OUT = 4            # out_channels
NUM_LAYERS = 2     # -> GATEConv + 1 GATConv atom layer (hardcoded below)
NUM_TIMESTEPS = 2
APPLY_SIGMOID = True   # hp['apply_sigmoid_in_last_layer']
NEG = -1e30


# ------------------------------------------------------- packed-param layout
def _layout(entries):
    """Row offsets for packed parameter buffers (each entry 8-row aligned)."""
    offs, off = {}, 0
    for name, rows in entries:
        offs[name] = off
        off += -(-rows // 8) * 8
    return offs, off


_PK32_ENTRIES = [            # lane width = HID (32)
    ("lin1_w", F_IN), ("lin1_b", 1),
    ("gate_w1", HID + E_DIM),            # [g_w1_x ; g_w1_e]
    ("gate_att", 2),                     # rows: attl^T, attr^T
    ("gate_w2", HID), ("gate_b", 1),
    ("a_w", HID), ("a_vec", 3),          # rows: a_asrc, a_adst, a_b
    ("m_w", HID), ("m_vec", 3),          # rows: m_asrc, m_adst, m_b
    ("lin2_w", HID), ("lin2_b", 1),
]
_PK128_ENTRIES = [           # lane width = 4*HID (128): fused GRU weights
    ("gru1_w", 2 * HID), ("gru1_b", 1),
    ("gru2_w", 2 * HID), ("gru2_b", 1),
    ("gru3_w", 2 * HID), ("gru3_b", 1),
]
PK32_OFF, PK32_ROWS = _layout(_PK32_ENTRIES)
PK128_OFF, PK128_ROWS = _layout(_PK128_ENTRIES)


# ---------------------------------------------------------------- math helpers
def _dotk(a, b):
    return jnp.dot(a, b, preferred_element_type=jnp.float32)


def _dotr(a, b):   # reference: full f32 precision so the tolerance can be tight
    return jnp.dot(a, b, preferred_element_type=jnp.float32,
                   precision=jax.lax.Precision.HIGHEST)


def _leaky(v, slope=0.01):
    return jnp.where(v > 0, v, slope * v)


def _elu(v):
    return jnp.where(v > 0, v, jnp.exp(v) - 1.0)


def _gru_fused(h_in, h_prev, wf, bf):
    """Fused PyTorch GRUCell: one (rows,2H)@(2H,4H) matmul.

    Column layout of wf/bf: [r | z | n_input | n_hidden]."""
    H = HID
    g = _dotk(jnp.concatenate([h_in, h_prev], axis=1), wf) + bf   # (rows, 4H)
    r = jax.nn.sigmoid(g[:, :H])
    z = jax.nn.sigmoid(g[:, H:2 * H])
    n = jnp.tanh(g[:, 2 * H:3 * H] + r * g[:, 3 * H:])
    return (1.0 - z) * n + z * h_prev


def _seg_softmax(alpha, onehot):
    """Segment softmax. alpha: (M,1); onehot: (M,S) one-hot of each row's segment."""
    masked = jnp.where(onehot > 0.5, alpha, NEG)                   # (M,S)
    seg_max = jnp.max(masked, axis=0, keepdims=True)               # (1,S)
    row_max = jnp.sum(onehot * seg_max, axis=1, keepdims=True)     # (M,1)
    exp_a = jnp.exp(alpha - row_max)                               # (M,1)
    seg_sum = jnp.sum(onehot * exp_a, axis=0, keepdims=True)       # (1,S)
    denom = jnp.sum(onehot * seg_sum, axis=1, keepdims=True) + 1e-16
    return exp_a / denom


# ---------------------------------------------------------------- Pallas kernel
def _attentive_fp_kernel(x_ref, ea_ref, scat_ref, sdt_ref, pool_ref, poolT_ref,
                         pk32_ref, pk128_ref, out_ref):
    H = HID

    # ---- per-block data (selectors arrive as bf16, upcast once; exact 0/1) --
    x0 = x_ref[0]                                   # (N, F_IN)
    ea = ea_ref[0]                                  # (E, E_DIM)
    scat = scat_ref[0].astype(jnp.float32)          # (2E, N): [s_src ; s_dst]
    sdt = sdt_ref[0].astype(jnp.float32)            # (N, E)   scatter-add to dst
    pool = pool_ref[0].astype(jnp.float32)          # (G, N)
    pool_t = poolT_ref[0].astype(jnp.float32)       # (N, G)
    E = scat.shape[0] // 2
    G = pool.shape[0]
    s_dst = scat[E:]                                # (E, N) for segment softmax

    # ---- packed parameters (static 8-aligned row offsets) -------------------
    def p32(name, rows, cols=None):
        o = PK32_OFF[name]
        return pk32_ref[o:o + rows, :] if cols is None else pk32_ref[o:o + rows, :cols]

    def p128(name, rows):
        o = PK128_OFF[name]
        return pk128_ref[o:o + rows, :]

    lin1_w = p32("lin1_w", F_IN)
    lin1_b = p32("lin1_b", 1)
    gate_w1 = p32("gate_w1", HID + E_DIM)           # [g_w1_x ; g_w1_e]
    gate_att = p32("gate_att", 2)
    attl, attr = gate_att[0:1], gate_att[1:2]       # (1, H) rows
    gate_w2 = p32("gate_w2", HID)
    gate_b = p32("gate_b", 1)
    a_w = p32("a_w", HID)
    a_vec = p32("a_vec", 3)
    a_asrc, a_adst, a_b = a_vec[0:1], a_vec[1:2], a_vec[2:3]
    m_w = p32("m_w", HID)
    m_vec = p32("m_vec", 3)
    m_asrc, m_adst, m_b = m_vec[0:1], m_vec[1:2], m_vec[2:3]
    lin2_w = p32("lin2_w", HID, OUT)
    lin2_b = p32("lin2_b", 1, OUT)
    gru1_w, gru1_b = p128("gru1_w", 2 * HID), p128("gru1_b", 1)
    gru2_w, gru2_b = p128("gru2_w", 2 * HID), p128("gru2_b", 1)
    gru3_w, gru3_b = p128("gru3_w", 2 * HID), p128("gru3_b", 1)

    # ---- atom embedding: lin1 + leaky_relu ----------------------------------
    x = _leaky(_dotk(x0, lin1_w) + lin1_b)                         # (N, H)

    # ---- GATEConv -----------------------------------------------------------
    xg = _dotk(scat, x)                                            # (2E, H) fused gather
    x_j, x_i = xg[:E], xg[E:]                                      # src / dst features
    h_e = _leaky(_dotk(jnp.concatenate([x_j, ea], axis=1), gate_w1))  # fused projection
    alpha = _leaky(jnp.sum(h_e * attl, axis=1, keepdims=True)
                   + jnp.sum(x_i * attr, axis=1, keepdims=True))   # (E,1) via VPU reduce
    alpha = _seg_softmax(alpha, s_dst)
    # TODO(synk): dropout on alpha / features skipped (eval mode -> identity)
    h = _elu(_dotk(sdt, _dotk(x_j, gate_w2) * alpha) + gate_b)     # scatter-add to dst
    x = jnp.maximum(_gru_fused(h, x, gru1_w, gru1_b), 0.0)

    # ---- atom GATConv layer (num_layers - 1 == 1) ---------------------------
    xs = _dotk(x, a_w)                                             # (N, H)
    xsg = _dotk(scat, xs)                                          # (2E, H) fused gather
    xs_src, xs_dst = xsg[:E], xsg[E:]
    alpha_e = _leaky(jnp.sum(xs_src * a_asrc, axis=1, keepdims=True)
                     + jnp.sum(xs_dst * a_adst, axis=1, keepdims=True))
    alpha_e = _seg_softmax(alpha_e, s_dst)
    h = _elu(_dotk(sdt, alpha_e * xs_src) + a_b)
    x = jnp.maximum(_gru_fused(h, x, gru2_w, gru2_b), 0.0)

    # ---- molecule embedding -------------------------------------------------
    out = jnp.maximum(_dotk(pool, x), 0.0)                         # (G, H)
    # loop-invariant (depends only on x): hoisted out of the timestep loop
    xsn = _dotk(x, m_w)                                            # (N, H)
    a_src_n = jnp.sum(xsn * m_asrc, axis=1, keepdims=True)         # (N, 1)
    for _ in range(NUM_TIMESTEPS):
        xsd = _dotk(out, m_w)                                      # (G, H)
        a_dst_g = jnp.sum(xsd * m_adst, axis=1, keepdims=True)     # (G, 1)
        if G == 1:
            a_dst_n = a_dst_g                  # single graph in block: broadcast
        else:
            a_dst_n = _dotk(pool_t, a_dst_g)   # one-hot broadcast graph -> nodes
        alpha_n = _leaky(a_src_n + a_dst_n)                        # (N, 1)
        alpha_n = _seg_softmax(alpha_n, pool_t)
        h = _elu(_dotk(pool, alpha_n * xsn) + m_b)                 # (G, H)
        out = jnp.maximum(_gru_fused(h, out, gru3_w, gru3_b), 0.0)

    # ---- predictor ----------------------------------------------------------
    y = _dotk(out, lin2_w) + lin2_b                                # (G, OUT)
    if APPLY_SIGMOID:
        y = jax.nn.sigmoid(y)
    out_ref[0] = y.astype(out_ref.dtype)


def attentive_fp_pallas(x_blk, ea_blk, scat_blk, sdt_blk, pool_blk, pool_t_blk,
                        pk32, pk128):
    nb, n_blk, _ = x_blk.shape
    e_blk = ea_blk.shape[1]
    g_blk = pool_blk.shape[1]

    def blk(*shape):
        return pl.BlockSpec((1,) + tuple(shape), lambda b: (b, 0, 0))

    out = pl.pallas_call(
        _attentive_fp_kernel,
        out_shape=jax.ShapeDtypeStruct((nb, g_blk, OUT), jnp.float32),
        grid=(nb,),
        in_specs=[
            blk(n_blk, F_IN),                              # node features
            blk(e_blk, E_DIM),                             # edge features
            blk(2 * e_blk, n_blk),                         # [s_src ; s_dst] one-hot (bf16)
            blk(n_blk, e_blk),                             # s_dst^T scatter matrix (bf16)
            blk(g_blk, n_blk),                             # pooling matrix (bf16)
            blk(n_blk, g_blk),                             # pooling^T (bf16)
            pl.BlockSpec(pk32.shape, lambda b: (0, 0)),    # packed params, lane=32
            pl.BlockSpec(pk128.shape, lambda b: (0, 0)),   # packed params, lane=128
        ],
        out_specs=blk(g_blk, OUT),
        compiler_params=pltpu.CompilerParams(
            dimension_semantics=("parallel",)),            # shard blocks across TCs (v7x)
    )(x_blk, ea_blk, scat_blk, sdt_blk, pool_blk, pool_t_blk, pk32, pk128)
    return out.reshape(nb * g_blk, OUT)


# ---------------------------------------------------------------- host-side packing
def _pad_block(a, rows, cols):
    a = a.astype(jnp.float32)
    return jnp.pad(a, ((0, rows - a.shape[0]), (0, cols - a.shape[1])))


def _fuse_gru(wih, whh, bih, bhh):
    """Build the fused (2H,4H)/(1,4H) GRU weight so one matmul replaces two."""
    H = HID
    wf = jnp.zeros((2 * H, 4 * H), jnp.float32)
    wf = wf.at[:H, :2 * H].set(wih[:, :2 * H])        # r,z from input
    wf = wf.at[H:, :2 * H].set(whh[:, :2 * H])        # r,z from hidden (summed by matmul)
    wf = wf.at[:H, 2 * H:3 * H].set(wih[:, 2 * H:])   # n (input side)
    wf = wf.at[H:, 3 * H:].set(whh[:, 2 * H:])        # n (hidden side, kept separate)
    bf = jnp.concatenate(
        [bih[:, :2 * H] + bhh[:, :2 * H], bih[:, 2 * H:], bhh[:, 2 * H:]], axis=1)
    return wf, bf


def pack_params(p):
    vals32 = {
        "lin1_w": p["lin1_w"], "lin1_b": p["lin1_b"],
        "gate_w1": jnp.concatenate([p["g_w1_x"], p["g_w1_e"]], axis=0),
        "gate_att": jnp.concatenate([p["g_attl"].T, p["g_attr"].T], axis=0),
        "gate_w2": p["g_w2"], "gate_b": p["g_b"],
        "a_w": p["a_w"],
        "a_vec": jnp.concatenate([p["a_asrc"], p["a_adst"], p["a_b"]], axis=0),
        "m_w": p["m_w"],
        "m_vec": jnp.concatenate([p["m_asrc"], p["m_adst"], p["m_b"]], axis=0),
        "lin2_w": p["lin2_w"], "lin2_b": p["lin2_b"],
    }
    vals128 = {}
    for name in ("gru1", "gru2", "gru3"):
        wf, bf = _fuse_gru(p[f"{name}_wih"], p[f"{name}_whh"],
                           p[f"{name}_bih"], p[f"{name}_bhh"])
        vals128[f"{name}_w"], vals128[f"{name}_b"] = wf, bf

    def build(entries, vals, cols):
        chunks = []
        for name, rows in entries:
            a = vals[name]
            assert a.shape[0] == rows, (name, a.shape, rows)
            chunks.append(_pad_block(a, -(-rows // 8) * 8, cols))
        return jnp.concatenate(chunks, axis=0)

    pk32 = build(_PK32_ENTRIES, vals32, HID)
    pk128 = build(_PK128_ENTRIES, vals128, 4 * HID)
    assert pk32.shape == (PK32_ROWS, HID)
    assert pk128.shape == (PK128_ROWS, 4 * HID)
    return pk32, pk128


# ---------------------------------------------------------------- pure-JAX reference
def _gru_ref(h_in, h_prev, wih, whh, bih, bhh):
    H = h_prev.shape[-1]
    gi = _dotr(h_in, wih) + bih
    gh = _dotr(h_prev, whh) + bhh
    r = jax.nn.sigmoid(gi[:, :H] + gh[:, :H])
    z = jax.nn.sigmoid(gi[:, H:2 * H] + gh[:, H:2 * H])
    n = jnp.tanh(gi[:, 2 * H:] + r * gh[:, 2 * H:])
    return (1.0 - z) * n + z * h_prev


def _seg_softmax_ref(alpha, index, num_segments):
    seg_max = jax.ops.segment_max(alpha, index, num_segments)
    ea = jnp.exp(alpha - seg_max[index])
    seg_sum = jax.ops.segment_sum(ea, index, num_segments)
    return ea / (seg_sum[index] + 1e-16)


def reference_forward(x, edge_index, edge_attr, batch, p, num_graphs):
    src, dst = edge_index[0], edge_index[1]
    N = x.shape[0]

    x = _leaky(_dotr(x, p["lin1_w"]) + p["lin1_b"])
    # GATEConv
    xj, xi = x[src], x[dst]
    he = _leaky(_dotr(xj, p["g_w1_x"]) + _dotr(edge_attr, p["g_w1_e"]))
    alpha = _leaky((_dotr(he, p["g_attl"]) + _dotr(xi, p["g_attr"]))[:, 0])
    alpha = _seg_softmax_ref(alpha, dst, N)
    h = _elu(jax.ops.segment_sum(_dotr(xj, p["g_w2"]) * alpha[:, None], dst, N) + p["g_b"])
    x = jnp.maximum(_gru_ref(h, x, p["gru1_wih"], p["gru1_whh"],
                             p["gru1_bih"], p["gru1_bhh"]), 0.0)
    # atom GATConv
    xs = _dotr(x, p["a_w"])
    a_src = jnp.sum(xs * p["a_asrc"], axis=1)
    a_dst = jnp.sum(xs * p["a_adst"], axis=1)
    ae = _seg_softmax_ref(_leaky(a_src[src] + a_dst[dst]), dst, N)
    h = _elu(jax.ops.segment_sum(ae[:, None] * xs[src], dst, N) + p["a_b"])
    x = jnp.maximum(_gru_ref(h, x, p["gru2_wih"], p["gru2_whh"],
                             p["gru2_bih"], p["gru2_bhh"]), 0.0)
    # molecule embedding
    out = jnp.maximum(jax.ops.segment_sum(x, batch, num_graphs), 0.0)
    for _ in range(NUM_TIMESTEPS):
        xsn, xsd = _dotr(x, p["m_w"]), _dotr(out, p["m_w"])
        a_src = jnp.sum(xsn * p["m_asrc"], axis=1)
        a_dst = jnp.sum(xsd * p["m_adst"], axis=1)
        an = _seg_softmax_ref(_leaky(a_src + a_dst[batch]), batch, num_graphs)
        h = _elu(jax.ops.segment_sum(an[:, None] * xsn, batch, num_graphs) + p["m_b"])
        out = jnp.maximum(_gru_ref(h, out, p["gru3_wih"], p["gru3_whh"],
                                   p["gru3_bih"], p["gru3_bhh"]), 0.0)
    y = _dotr(out, p["lin2_w"]) + p["lin2_b"]
    return jax.nn.sigmoid(y) if APPLY_SIGMOID else y


# ---------------------------------------------------------------- param init
def init_params(key):
    ks = iter(jax.random.split(key, 32))

    def w(shape, scale=0.2):
        return (scale * jax.random.normal(next(ks), shape)).astype(jnp.float32)

    p = {}
    p["lin1_w"], p["lin1_b"] = w((F_IN, HID)), w((1, HID))
    p["g_w1_x"], p["g_w1_e"] = w((HID, HID)), w((E_DIM, HID))
    p["g_attl"], p["g_attr"] = w((HID, 1)), w((HID, 1))
    p["g_w2"], p["g_b"] = w((HID, HID)), w((1, HID))
    for name in ("gru1", "gru2", "gru3"):
        p[f"{name}_wih"], p[f"{name}_whh"] = w((HID, 3 * HID)), w((HID, 3 * HID))
        p[f"{name}_bih"], p[f"{name}_bhh"] = w((1, 3 * HID)), w((1, 3 * HID))
    p["a_w"], p["a_asrc"], p["a_adst"], p["a_b"] = (
        w((HID, HID)), w((1, HID)), w((1, HID)), w((1, HID)))
    p["m_w"], p["m_asrc"], p["m_adst"], p["m_b"] = (
        w((HID, HID)), w((1, HID)), w((1, HID)), w((1, HID)))
    p["lin2_w"], p["lin2_b"] = w((HID, OUT)), w((1, OUT))
    return p


# ---------------------------------------------------------------- main
if __name__ == "__main__":
    N_PER_G, B = 8, 2
    G_PER_BLOCK = 1                  # graphs per grid block (block = grid step)
    NUM_BLOCKS = B // G_PER_BLOCK
    N_BLK = N_PER_G * G_PER_BLOCK    # nodes per block
    E_BLK = 2 * N_PER_G * G_PER_BLOCK  # edges per block
    N = N_PER_G * B

    # bidirectional ring graph inside each molecule (edges ordered by graph)
    srcs, dsts = [], []
    for g in range(B):
        base = g * N_PER_G
        for i in range(N_PER_G):
            srcs += [base + i, base + (i + 1) % N_PER_G]
            dsts += [base + (i + 1) % N_PER_G, base + i]
    edge_index = jnp.array([srcs, dsts], dtype=jnp.int32)   # (2, E)
    E = edge_index.shape[1]
    batch = jnp.repeat(jnp.arange(B, dtype=jnp.int32), N_PER_G)

    key = jax.random.PRNGKey(0)
    kx, ke, kp = jax.random.split(key, 3)
    x = jax.random.normal(kx, (N, F_IN), dtype=jnp.float32)
    edge_attr = jax.random.normal(ke, (E, E_DIM), dtype=jnp.float32)
    params = init_params(kp)

    # --- blocked (per-graph) layout for the gridded kernel --------------------
    # Every graph here has identical node/edge counts so blocking is a reshape.
    # TODO(synk): ragged graphs would need per-block node/edge padding.
    x_blk = x.reshape(NUM_BLOCKS, N_BLK, F_IN)
    ea_blk = edge_attr.reshape(NUM_BLOCKS, E_BLK, E_DIM)

    node_base = (jnp.arange(NUM_BLOCKS, dtype=jnp.int32) * N_BLK)[:, None]
    src_local = edge_index[0].reshape(NUM_BLOCKS, E_BLK) - node_base
    dst_local = edge_index[1].reshape(NUM_BLOCKS, E_BLK) - node_base
    s_src_blk = jax.nn.one_hot(src_local, N_BLK, dtype=jnp.float32)   # (NB, E, N)
    s_dst_blk = jax.nn.one_hot(dst_local, N_BLK, dtype=jnp.float32)   # (NB, E, N)
    # selectors shipped as bf16 (exact for 0/1) to halve DMA bytes
    scat_blk = jnp.concatenate([s_src_blk, s_dst_blk], axis=1).astype(jnp.bfloat16)
    sdt_blk = jnp.swapaxes(s_dst_blk, 1, 2).astype(jnp.bfloat16)      # (NB, N, E)

    batch_local = batch.reshape(NUM_BLOCKS, N_BLK) % G_PER_BLOCK
    pool_t_blk = jax.nn.one_hot(batch_local, G_PER_BLOCK, dtype=jnp.float32)  # (NB, N, G)
    pool_blk = jnp.swapaxes(pool_t_blk, 1, 2).astype(jnp.bfloat16)            # (NB, G, N)
    pool_t_blk = pool_t_blk.astype(jnp.bfloat16)

    pk32, pk128 = pack_params(params)

    out = attentive_fp_pallas(x_blk, ea_blk, scat_blk, sdt_blk,
                              pool_blk, pool_t_blk, pk32, pk128)
    out = jax.block_until_ready(out)

    ref = jax.block_until_ready(
        reference_forward(x, edge_index, edge_attr, batch, params, B))
    assert out.shape == (B, OUT)
    # tolerance tightened from 5e-2 -> 1e-3 (all compute stays f32)
    assert np.allclose(np.asarray(out), np.asarray(ref), atol=1e-3, rtol=1e-3), (out, ref)

    print("KERNEL_OK")
</pallas_src>

<mosaic_0001>
module attributes {stable_mosaic.version = 11 : i64} {
  func.func @_attentive_fp_kernel(%arg0: i32, %arg1: memref<1x8x16xf32, #tpu.memory_space<vmem>>, %arg2: memref<1x16x8xf32, #tpu.memory_space<vmem>>, %arg3: memref<1x32x8xbf16, #tpu.memory_space<vmem>>, %arg4: memref<1x8x16xbf16, #tpu.memory_space<vmem>>, %arg5: memref<1x1x8xbf16, #tpu.memory_space<vmem>>, %arg6: memref<1x8x1xbf16, #tpu.memory_space<vmem>>, %arg7: memref<232x32xf32, #tpu.memory_space<vmem>>, %arg8: memref<216x128xf32, #tpu.memory_space<vmem>>, %arg9: memref<1x1x4xf32, #tpu.memory_space<vmem>>) attributes {dimension_semantics = [#tpu.dimension_semantics<parallel>], iteration_bounds = array<i64: 2>, scalar_prefetch = 0 : i64, scratch_operands = 0 : i64, tpu.core_type = #tpu.core_type<tc>, window_params = [{transform_indices = @transform_0, window_bounds = array<i64: 1, 8, 16>}, {transform_indices = @transform_1, window_bounds = array<i64: 1, 16, 8>}, {transform_indices = @transform_2, window_bounds = array<i64: 1, 32, 8>}, {transform_indices = @transform_3, window_bounds = array<i64: 1, 8, 16>}, {transform_indices = @transform_4, window_bounds = array<i64: 1, 1, 8>}, {transform_indices = @transform_5, window_bounds = array<i64: 1, 8, 1>}, {pipeline_mode = #tpu.pipeline_mode<synchronous>, transform_indices = @transform_6, window_bounds = array<i64: 232, 32>}, {pipeline_mode = #tpu.pipeline_mode<synchronous>, transform_indices = @transform_7, window_bounds = array<i64: 216, 128>}, {transform_indices = @transform_8, window_bounds = array<i64: 1, 1, 4>}]} {
    %c0 = arith.constant 0 : index
    %c0_0 = arith.constant 0 : index
    %c0_1 = arith.constant 0 : index
    %0 = vector.load %arg1[%c0, %c0_0, %c0_1] : memref<1x8x16xf32, #tpu.memory_space<vmem>>, vector<1x8x16xf32>
    %1 = vector.shape_cast %0 : vector<1x8x16xf32> to vector<8x16xf32>
    %c0_2 = arith.constant 0 : index
    %c0_3 = arith.constant 0 : index
    %c0_4 = arith.constant 0 : index
    %2 = vector.load %arg2[%c0_2, %c0_3, %c0_4] : memref<1x16x8xf32, #tpu.memory_space<vmem>>, vector<1x16x8xf32>
    %3 = vector.shape_cast %2 : vector<1x16x8xf32> to vector<16x8xf32>
    %c0_5 = arith.constant 0 : index
    %c0_6 = arith.constant 0 : index
    %c0_7 = arith.constant 0 : index
    %4 = vector.load %arg3[%c0_5, %c0_6, %c0_7] : memref<1x32x8xbf16, #tpu.memory_space<vmem>>, vector<1x32x8xbf16>
    %5 = vector.shape_cast %4 : vector<1x32x8xbf16> to vector<32x8xbf16>
    %6 = arith.extf %5 : vector<32x8xbf16> to vector<32x8xf32>
    %c0_8 = arith.constant 0 : index
    %c0_9 = arith.constant 0 : index
    %c0_10 = arith.constant 0 : index
    %7 = vector.load %arg4[%c0_8, %c0_9, %c0_10] : memref<1x8x16xbf16, #tpu.memory_space<vmem>>, vector<1x8x16xbf16>
    %8 = vector.shape_cast %7 : vector<1x8x16xbf16> to vector<8x16xbf16>
    %9 = arith.extf %8 : vector<8x16xbf16> to vector<8x16xf32>
    %c0_11 = arith.constant 0 : index
    %c0_12 = arith.constant 0 : index
    %c0_13 = arith.constant 0 : index
    %10 = vector.load %arg5[%c0_11, %c0_12, %c0_13] : memref<1x1x8xbf16, #tpu.memory_space<vmem>>, vector<1x1x8xbf16>
    %11 = vector.shape_cast %10 : vector<1x1x8xbf16> to vector<1x8xbf16>
    %12 = arith.extf %11 : vector<1x8xbf16> to vector<1x8xf32>
    %c0_14 = arith.constant 0 : index
    %c0_15 = arith.constant 0 : index
    %c0_16 = arith.constant 0 : index
    %13 = vector.load %arg6[%c0_14, %c0_15, %c0_16] : memref<1x8x1xbf16, #tpu.memory_space<vmem>>, vector<1x8x1xbf16>
    %14 = vector.shape_cast %13 : vector<1x8x1xbf16> to vector<8x1xbf16>
    %15 = arith.extf %14 : vector<8x1xbf16> to vector<8x1xf32>
    %16 = vector.extract_strided_slice %6 {offsets = [16, 0], sizes = [16, 8], strides = [1, 1]} : vector<32x8xf32> to vector<16x8xf32>
    %c0_17 = arith.constant 0 : index
    %c0_18 = arith.constant 0 : index
    %17 = vector.load %arg7[%c0_17, %c0_18] : memref<232x32xf32, #tpu.memory_space<vmem>>, vector<16x32xf32>
    %c16 = arith.constant 16 : index
    %c0_19 = arith.constant 0 : index
    %18 = vector.load %arg7[%c16, %c0_19] : memref<232x32xf32, #tpu.memory_space<vmem>>, vector<1x32xf32>
    %c24 = arith.constant 24 : index
    %c0_20 = arith.constant 0 : index
    %19 = vector.load %arg7[%c24, %c0_20] : memref<232x32xf32, #tpu.memory_space<vmem>>, vector<40x32xf32>
    %c64 = arith.constant 64 : index
    %c0_21 = arith.constant 0 : index
    %20 = vector.load %arg7[%c64, %c0_21] : memref<232x32xf32, #tpu.memory_space<vmem>>, vector<2x32xf32>
    %21 = vector.extract_strided_slice %20 {offsets = [0, 0], sizes = [1, 32], strides = [1, 1]} : vector<2x32xf32> to vector<1x32xf32>
    %22 = vector.extract_strided_slice %20 {offsets = [1, 0], sizes = [1, 32], strides = [1, 1]} : vector<2x32xf32> to vector<1x32xf32>
    %c72 = arith.constant 72 : index
    %c0_22 = arith.constant 0 : index
    %23 = vector.load %arg7[%c72, %c0_22] : memref<232x32xf32, #tpu.memory_space<vmem>>, vector<32x32xf32>
    %c104 = arith.constant 104 : index
    %c0_23 = arith.constant 0 : index
    %24 = vector.load %arg7[%c104, %c0_23] : memref<232x32xf32, #tpu.memory_space<vmem>>, vector<1x32xf32>
    %c112 = arith.constant 112 : index
    %c0_24 = arith.constant 0 : index
    %25 = vector.load %arg7[%c112, %c0_24] : memref<232x32xf32, #tpu.memory_space<vmem>>, vector<32x32xf32>
    %c144 = arith.constant 144 : index
    %c0_25 = arith.constant 0 : index
    %26 = vector.load %arg7[%c144, %c0_25] : memref<232x32xf32, #tpu.memory_space<vmem>>, vector<3x32xf32>
    %27 = vector.extract_strided_slice %26 {offsets = [0, 0], sizes = [1, 32], strides = [1, 1]} : vector<3x32xf32> to vector<1x32xf32>
    %28 = vector.extract_strided_slice %26 {offsets = [1, 0], sizes = [1, 32], strides = [1, 1]} : vector<3x32xf32> to vector<1x32xf32>
    %29 = vector.extract_strided_slice %26 {offsets = [2, 0], sizes = [1, 32], strides = [1, 1]} : vector<3x32xf32> to vector<1x32xf32>
    %c152 = arith.constant 152 : index
    %c0_26 = arith.constant 0 : index
    %30 = vector.load %arg7[%c152, %c0_26] : memref<232x32xf32, #tpu.memory_space<vmem>>, vector<32x32xf32>
    %c184 = arith.constant 184 : index
    %c0_27 = arith.constant 0 : index
    %31 = vector.load %arg7[%c184, %c0_27] : memref<232x32xf32, #tpu.memory_space<vmem>>, vector<3x32xf32>
    %32 = vector.extract_strided_slice %31 {offsets = [0, 0], sizes = [1, 32], strides = [1, 1]} : vector<3x32xf32> to vector<1x32xf32>
    %33 = vector.extract_strided_slice %31 {offsets = [1, 0], sizes = [1, 32], strides = [1, 1]} : vector<3x32xf32> to vector<1x32xf32>
    %34 = vector.extract_strided_slice %31 {offsets = [2, 0], sizes = [1, 32], strides = [1, 1]} : vector<3x32xf32> to vector<1x32xf32>
    %c192 = arith.constant 192 : index
    %c0_28 = arith.constant 0 : index
    %35 = vector.load %arg7[%c192, %c0_28] : memref<232x32xf32, #tpu.memory_space<vmem>>, vector<32x4xf32>
    %c224 = arith.constant 224 : index
    %c0_29 = arith.constant 0 : index
    %36 = vector.load %arg7[%c224, %c0_29] : memref<232x32xf32, #tpu.memory_space<vmem>>, vector<1x4xf32>
    %c0_30 = arith.constant 0 : index
    %c0_31 = arith.constant 0 : index
    %37 = vector.load %arg8[%c0_30, %c0_31] : memref<216x128xf32, #tpu.memory_space<vmem>>, vector<64x128xf32>
    %c64_32 = arith.constant 64 : index
    %c0_33 = arith.constant 0 : index
    %38 = vector.load %arg8[%c64_32, %c0_33] : memref<216x128xf32, #tpu.memory_space<vmem>>, vector<1x128xf32>
    %c72_34 = arith.constant 72 : index
    %c0_35 = arith.constant 0 : index
    %39 = vector.load %arg8[%c72_34, %c0_35] : memref<216x128xf32, #tpu.memory_space<vmem>>, vector<64x128xf32>
    %c136 = arith.constant 136 : index
    %c0_36 = arith.constant 0 : index
    %40 = vector.load %arg8[%c136, %c0_36] : memref<216x128xf32, #tpu.memory_space<vmem>>, vector<1x128xf32>
    %c144_37 = arith.constant 144 : index
    %c0_38 = arith.constant 0 : index
    %41 = vector.load %arg8[%c144_37, %c0_38] : memref<216x128xf32, #tpu.memory_space<vmem>>, vector<64x128xf32>
    %c208 = arith.constant 208 : index
    %c0_39 = arith.constant 0 : index
    %42 = vector.load %arg8[%c208, %c0_39] : memref<216x128xf32, #tpu.memory_space<vmem>>, vector<1x128xf32>
    %cst = arith.constant dense<0.000000e+00> : vector<8x32xf32>
    %43 = tpu.matmul %1, %17, %cst {dimension_numbers = #tpu.dot_dimension_numbers<[1], [0], [0], [1], [0, 0, 1, 1], [], []>} : vector<8x16xf32>, vector<16x32xf32>, vector<8x32xf32> -> vector<8x32xf32>
    %44 = vector.broadcast %18 : vector<1x32xf32> to vector<8x32xf32>
    %45 = arith.addf %43, %44 : vector<8x32xf32>
    %cst_40 = arith.constant 0.000000e+00 : f32
    %46 = vector.broadcast %cst_40 : f32 to vector<8x32xf32>
    %47 = arith.cmpf ogt, %45, %46 : vector<8x32xf32>
    %cst_41 = arith.constant 0.00999999977 : f32
    %48 = vector.broadcast %cst_41 : f32 to vector<8x32xf32>
    %49 = arith.mulf %48, %45 : vector<8x32xf32>
    %50 = arith.select %47, %45, %49 : vector<8x32xi1>, vector<8x32xf32>
    %cst_42 = arith.constant dense<0.000000e+00> : vector<32x32xf32>
    %51 = tpu.matmul %6, %50, %cst_42 {dimension_numbers = #tpu.dot_dimension_numbers<[1], [0], [0], [1], [0, 0, 1, 1], [], []>} : vector<32x8xf32>, vector<8x32xf32>, vector<32x32xf32> -> vector<32x32xf32>
    %52 = vector.extract_strided_slice %51 {offsets = [0, 0], sizes = [16, 32], strides = [1, 1]} : vector<32x32xf32> to vector<16x32xf32>
    %53 = vector.extract_strided_slice %51 {offsets = [16, 0], sizes = [16, 32], strides = [1, 1]} : vector<32x32xf32> to vector<16x32xf32>
    %54 = tpu.concatenate %52, %3 in 1 : vector<16x32xf32>, vector<16x8xf32> -> vector<16x40xf32>
    %cst_43 = arith.constant dense<0.000000e+00> : vector<16x32xf32>
    %55 = tpu.matmul %54, %19, %cst_43 {dimension_numbers = #tpu.dot_dimension_numbers<[1], [0], [0], [1], [0, 0, 1, 1], [], []>} : vector<16x40xf32>, vector<40x32xf32>, vector<16x32xf32> -> vector<16x32xf32>
    %cst_44 = arith.constant 0.000000e+00 : f32
    %56 = vector.broadcast %cst_44 : f32 to vector<16x32xf32>
    %57 = arith.cmpf ogt, %55, %56 : vector<16x32xf32>
    %cst_45 = arith.constant 0.00999999977 : f32
    %58 = vector.broadcast %cst_45 : f32 to vector<16x32xf32>
    %59 = arith.mulf %58, %55 : vector<16x32xf32>
    %60 = arith.select %57, %55, %59 : vector<16x32xi1>, vector<16x32xf32>
    %61 = vector.broadcast %21 : vector<1x32xf32> to vector<16x32xf32>
    %62 = arith.mulf %60, %61 : vector<16x32xf32>
    %cst_46 = arith.constant dense<0.000000e+00> : vector<16xf32>
    %63 = vector.multi_reduction <add>, %62, %cst_46 [1] : vector<16x32xf32> to vector<16xf32>
    %64 = vector.shape_cast %63 : vector<16xf32> to vector<16x1xf32>
    %65 = vector.broadcast %22 : vector<1x32xf32> to vector<16x32xf32>
    %66 = arith.mulf %53, %65 : vector<16x32xf32>
    %cst_47 = arith.constant dense<0.000000e+00> : vector<16xf32>
    %67 = vector.multi_reduction <add>, %66, %cst_47 [1] : vector<16x32xf32> to vector<16xf32>
    %68 = vector.shape_cast %67 : vector<16xf32> to vector<16x1xf32>
    %69 = arith.addf %64, %68 : vector<16x1xf32>
    %cst_48 = arith.constant 0.000000e+00 : f32
    %70 = vector.broadcast %cst_48 : f32 to vector<16x1xf32>
    %71 = arith.cmpf ogt, %69, %70 : vector<16x1xf32>
    %cst_49 = arith.constant 0.00999999977 : f32
    %72 = vector.broadcast %cst_49 : f32 to vector<16x1xf32>
    %73 = arith.mulf %72, %69 : vector<16x1xf32>
    %74 = arith.select %71, %69, %73 : vector<16x1xi1>, vector<16x1xf32>
    %cst_50 = arith.constant 5.000000e-01 : f32
    %75 = vector.broadcast %cst_50 : f32 to vector<16x8xf32>
    %76 = arith.cmpf ogt, %16, %75 : vector<16x8xf32>
    %cst_51 = arith.constant -1.000000e+30 : f32
    %77 = vector.shape_cast %74 : vector<16x1xf32> to vector<16x1xf32>
    %78 = vector.broadcast %77 : vector<16x1xf32> to vector<16x8xf32>
    %79 = vector.broadcast %cst_51 : f32 to vector<16x8xf32>
    %80 = arith.select %76, %78, %79 : vector<16x8xi1>, vector<16x8xf32>
    %cst_52 = arith.constant dense<0xFF800000> : vector<8xf32>
    %81 = vector.multi_reduction <maximumf>, %80, %cst_52 [0] : vector<16x8xf32> to vector<8xf32>
    %82 = vector.shape_cast %81 : vector<8xf32> to vector<1x8xf32>
    %83 = vector.broadcast %82 : vector<1x8xf32> to vector<16x8xf32>
    %84 = arith.mulf %16, %83 : vector<16x8xf32>
    %cst_53 = arith.constant dense<0.000000e+00> : vector<16xf32>
    %85 = vector.multi_reduction <add>, %84, %cst_53 [1] : vector<16x8xf32> to vector<16xf32>
    %86 = vector.shape_cast %85 : vector<16xf32> to vector<16x1xf32>
    %87 = arith.subf %74, %86 : vector<16x1xf32>
    %88 = math.exp %87 : vector<16x1xf32>
    %89 = vector.broadcast %88 : vector<16x1xf32> to vector<16x8xf32>
    %90 = arith.mulf %16, %89 : vector<16x8xf32>
    %cst_54 = arith.constant dense<0.000000e+00> : vector<8xf32>
    %91 = vector.multi_reduction <add>, %90, %cst_54 [0] : vector<16x8xf32> to vector<8xf32>
    %92 = vector.shape_cast %91 : vector<8xf32> to vector<1x8xf32>
    %93 = vector.broadcast %92 : vector<1x8xf32> to vector<16x8xf32>
    %94 = arith.mulf %16, %93 : vector<16x8xf32>
    %cst_55 = arith.constant dense<0.000000e+00> : vector<16xf32>
    %95 = vector.multi_reduction <add>, %94, %cst_55 [1] : vector<16x8xf32> to vector<16xf32>
    %96 = vector.shape_cast %95 : vector<16xf32> to vector<16x1xf32>
    %cst_56 = arith.constant 1.000000e-16 : f32
    %97 = vector.broadcast %cst_56 : f32 to vector<16x1xf32>
    %98 = arith.addf %96, %97 : vector<16x1xf32>
    %99 = arith.divf %88, %98 : vector<16x1xf32>
    %cst_57 = arith.constant dense<0.000000e+00> : vector<16x32xf32>
    %100 = tpu.matmul %52, %23, %cst_57 {dimension_numbers = #tpu.dot_dimension_numbers<[1], [0], [0], [1], [0, 0, 1, 1], [], []>} : vector<16x32xf32>, vector<32x32xf32>, vector<16x32xf32> -> vector<16x32xf32>
    %101 = vector.broadcast %99 : vector<16x1xf32> to vector<16x32xf32>
    %102 = arith.mulf %100, %101 : vector<16x32xf32>
    %cst_58 = arith.constant dense<0.000000e+00> : vector<8x32xf32>
    %103 = tpu.matmul %9, %102, %cst_58 {dimension_numbers = #tpu.dot_dimension_numbers<[1], [0], [0], [1], [0, 0, 1, 1], [], []>} : vector<8x16xf32>, vector<16x32xf32>, vector<8x32xf32> -> vector<8x32xf32>
    %104 = vector.broadcast %24 : vector<1x32xf32> to vector<8x32xf32>
    %105 = arith.addf %103, %104 : vector<8x32xf32>
    %cst_59 = arith.constant 0.000000e+00 : f32
    %106 = vector.broadcast %cst_59 : f32 to vector<8x32xf32>
    %107 = arith.cmpf ogt, %105, %106 : vector<8x32xf32>
    %108 = math.exp %105 : vector<8x32xf32>
    %cst_60 = arith.constant 1.000000e+00 : f32
    %109 = vector.broadcast %cst_60 : f32 to vector<8x32xf32>
    %110 = arith.subf %108, %109 : vector<8x32xf32>
    %111 = arith.select %107, %105, %110 : vector<8x32xi1>, vector<8x32xf32>
    %112 = tpu.concatenate %111, %50 in 1 : vector<8x32xf32>, vector<8x32xf32> -> vector<8x64xf32>
    %cst_61 = arith.constant dense<0.000000e+00> : vector<8x128xf32>
    %113 = tpu.matmul %112, %37, %cst_61 {dimension_numbers = #tpu.dot_dimension_numbers<[1], [0], [0], [1], [0, 0, 1, 1], [], []>} : vector<8x64xf32>, vector<64x128xf32>, vector<8x128xf32> -> vector<8x128xf32>
    %114 = vector.broadcast %38 : vector<1x128xf32> to vector<8x128xf32>
    %115 = arith.addf %113, %114 : vector<8x128xf32>
    %116 = vector.extract_strided_slice %115 {offsets = [0, 0], sizes = [8, 32], strides = [1, 1]} : vector<8x128xf32> to vector<8x32xf32>
    %117 = arith.negf %116 : vector<8x32xf32>
    %118 = math.exp %117 : vector<8x32xf32>
    %cst_62 = arith.constant 1.000000e+00 : f32
    %119 = vector.broadcast %cst_62 : f32 to vector<8x32xf32>
    %120 = arith.addf %119, %118 : vector<8x32xf32>
    %121 = arith.divf %119, %120 : vector<8x32xf32>
    %122 = vector.extract_strided_slice %115 {offsets = [0, 32], sizes = [8, 32], strides = [1, 1]} : vector<8x128xf32> to vector<8x32xf32>
    %123 = arith.negf %122 : vector<8x32xf32>
    %124 = math.exp %123 : vector<8x32xf32>
    %cst_63 = arith.constant 1.000000e+00 : f32
    %125 = vector.broadcast %cst_63 : f32 to vector<8x32xf32>
    %126 = arith.addf %125, %124 : vector<8x32xf32>
    %127 = arith.divf %125, %126 : vector<8x32xf32>
    %128 = vector.extract_strided_slice %115 {offsets = [0, 64], sizes = [8, 32], strides = [1, 1]} : vector<8x128xf32> to vector<8x32xf32>
    %129 = vector.extract_strided_slice %115 {offsets = [0, 96], sizes = [8, 32], strides = [1, 1]} : vector<8x128xf32> to vector<8x32xf32>
    %130 = arith.mulf %121, %129 : vector<8x32xf32>
    %131 = arith.addf %128, %130 : vector<8x32xf32>
    %132 = math.tanh %131 : vector<8x32xf32>
    %cst_64 = arith.constant 1.000000e+00 : f32
    %133 = vector.broadcast %cst_64 : f32 to vector<8x32xf32>
    %134 = arith.subf %133, %127 : vector<8x32xf32>
    %135 = arith.mulf %134, %132 : vector<8x32xf32>
    %136 = arith.mulf %127, %50 : vector<8x32xf32>
    %137 = arith.addf %135, %136 : vector<8x32xf32>
    %cst_65 = arith.constant 0.000000e+00 : f32
    %138 = vector.broadcast %cst_65 : f32 to vector<8x32xf32>
    %139 = arith.maximumf %137, %138 : vector<8x32xf32>
    %cst_66 = arith.constant dense<0.000000e+00> : vector<8x32xf32>
    %140 = tpu.matmul %139, %25, %cst_66 {dimension_numbers = #tpu.dot_dimension_numbers<[1], [0], [0], [1], [0, 0, 1, 1], [], []>} : vector<8x32xf32>, vector<32x32xf32>, vector<8x32xf32> -> vector<8x32xf32>
    %cst_67 = arith.constant dense<0.000000e+00> : vector<32x32xf32>
    %141 = tpu.matmul %6, %140, %cst_67 {dimension_numbers = #tpu.dot_dimension_numbers<[1], [0], [0], [1], [0, 0, 1, 1], [], []>} : vector<32x8xf32>, vector<8x32xf32>, vector<32x32xf32> -> vector<32x32xf32>
    %142 = vector.extract_strided_slice %141 {offsets = [0, 0], sizes = [16, 32], strides = [1, 1]} : vector<32x32xf32> to vector<16x32xf32>
    %143 = vector.extract_strided_slice %141 {offsets = [16, 0], sizes = [16, 32], strides = [1, 1]} : vector<32x32xf32> to vector<16x32xf32>
    %144 = vector.broadcast %27 : vector<1x32xf32> to vector<16x32xf32>
    %145 = arith.mulf %142, %144 : vector<16x32xf32>
    %cst_68 = arith.constant dense<0.000000e+00> : vector<16xf32>
    %146 = vector.multi_reduction <add>, %145, %cst_68 [1] : vector<16x32xf32> to vector<16xf32>
    %147 = vector.shape_cast %146 : vector<16xf32> to vector<16x1xf32>
    %148 = vector.broadcast %28 : vector<1x32xf32> to vector<16x32xf32>
    %149 = arith.mulf %143, %148 : vector<16x32xf32>
    %cst_69 = arith.constant dense<0.000000e+00> : vector<16xf32>
    %150 = vector.multi_reduction <add>, %149, %cst_69 [1] : vector<16x32xf32> to vector<16xf32>
    %151 = vector.shape_cast %150 : vector<16xf32> to vector<16x1xf32>
    %152 = arith.addf %147, %151 : vector<16x1xf32>
    %cst_70 = arith.constant 0.000000e+00 : f32
    %153 = vector.broadcast %cst_70 : f32 to vector<16x1xf32>
    %154 = arith.cmpf ogt, %152, %153 : vector<16x1xf32>
    %cst_71 = arith.constant 0.00999999977 : f32
    %155 = vector.broadcast %cst_71 : f32 to vector<16x1xf32>
    %156 = arith.mulf %155, %152 : vector<16x1xf32>
    %157 = arith.select %154, %152, %156 : vector<16x1xi1>, vector<16x1xf32>
    %cst_72 = arith.constant 5.000000e-01 : f32
    %158 = vector.broadcast %cst_72 : f32 to vector<16x8xf32>
    %159 = arith.cmpf ogt, %16, %158 : vector<16x8xf32>
    %cst_73 = arith.constant -1.000000e+30 : f32
    %160 = vector.shape_cast %157 : vector<16x1xf32> to vector<16x1xf32>
    %161 = vector.broadcast %160 : vector<16x1xf32> to vector<16x8xf32>
    %162 = vector.broadcast %cst_73 : f32 to vector<16x8xf32>
    %163 = arith.select %159, %161, %162 : vector<16x8xi1>, vector<16x8xf32>
    %cst_74 = arith.constant dense<0xFF800000> : vector<8xf32>
    %164 = vector.multi_reduction <maximumf>, %163, %cst_74 [0] : vector<16x8xf32> to vector<8xf32>
    %165 = vector.shape_cast %164 : vector<8xf32> to vector<1x8xf32>
    %166 = vector.broadcast %165 : vector<1x8xf32> to vector<16x8xf32>
    %167 = arith.mulf %16, %166 : vector<16x8xf32>
    %cst_75 = arith.constant dense<0.000000e+00> : vector<16xf32>
    %168 = vector.multi_reduction <add>, %167, %cst_75 [1] : vector<16x8xf32> to vector<16xf32>
    %169 = vector.shape_cast %168 : vector<16xf32> to vector<16x1xf32>
    %170 = arith.subf %157, %169 : vector<16x1xf32>
    %171 = math.exp %170 : vector<16x1xf32>
    %172 = vector.broadcast %171 : vector<16x1xf32> to vector<16x8xf32>
    %173 = arith.mulf %16, %172 : vector<16x8xf32>
    %cst_76 = arith.constant dense<0.000000e+00> : vector<8xf32>
    %174 = vector.multi_reduction <add>, %173, %cst_76 [0] : vector<16x8xf32> to vector<8xf32>
    %175 = vector.shape_cast %174 : vector<8xf32> to vector<1x8xf32>
    %176 = vector.broadcast %175 : vector<1x8xf32> to vector<16x8xf32>
    %177 = arith.mulf %16, %176 : vector<16x8xf32>
    %cst_77 = arith.constant dense<0.000000e+00> : vector<16xf32>
    %178 = vector.multi_reduction <add>, %177, %cst_77 [1] : vector<16x8xf32> to vector<16xf32>
    %179 = vector.shape_cast %178 : vector<16xf32> to vector<16x1xf32>
    %cst_78 = arith.constant 1.000000e-16 : f32
    %180 = vector.broadcast %cst_78 : f32 to vector<16x1xf32>
    %181 = arith.addf %179, %180 : vector<16x1xf32>
    %182 = arith.divf %171, %181 : vector<16x1xf32>
    %183 = vector.broadcast %182 : vector<16x1xf32> to vector<16x32xf32>
    %184 = arith.mulf %183, %142 : vector<16x32xf32>
    %cst_79 = arith.constant dense<0.000000e+00> : vector<8x32xf32>
    %185 = tpu.matmul %9, %184, %cst_79 {dimension_numbers = #tpu.dot_dimension_numbers<[1], [0], [0], [1], [0, 0, 1, 1], [], []>} : vector<8x16xf32>, vector<16x32xf32>, vector<8x32xf32> -> vector<8x32xf32>
    %186 = vector.broadcast %29 : vector<1x32xf32> to vector<8x32xf32>
    %187 = arith.addf %185, %186 : vector<8x32xf32>
    %cst_80 = arith.constant 0.000000e+00 : f32
    %188 = vector.broadcast %cst_80 : f32 to vector<8x32xf32>
    %189 = arith.cmpf ogt, %187, %188 : vector<8x32xf32>
    %190 = math.exp %187 : vector<8x32xf32>
    %cst_81 = arith.constant 1.000000e+00 : f32
    %191 = vector.broadcast %cst_81 : f32 to vector<8x32xf32>
    %192 = arith.subf %190, %191 : vector<8x32xf32>
    %193 = arith.select %189, %187, %192 : vector<8x32xi1>, vector<8x32xf32>
    %194 = tpu.concatenate %193, %139 in 1 : vector<8x32xf32>, vector<8x32xf32> -> vector<8x64xf32>
    %cst_82 = arith.constant dense<0.000000e+00> : vector<8x128xf32>
    %195 = tpu.matmul %194, %39, %cst_82 {dimension_numbers = #tpu.dot_dimension_numbers<[1], [0], [0], [1], [0, 0, 1, 1], [], []>} : vector<8x64xf32>, vector<64x128xf32>, vector<8x128xf32> -> vector<8x128xf32>
    %196 = vector.broadcast %40 : vector<1x128xf32> to vector<8x128xf32>
    %197 = arith.addf %195, %196 : vector<8x128xf32>
    %198 = vector.extract_strided_slice %197 {offsets = [0, 0], sizes = [8, 32], strides = [1, 1]} : vector<8x128xf32> to vector<8x32xf32>
    %199 = arith.negf %198 : vector<8x32xf32>
    %200 = math.exp %199 : vector<8x32xf32>
    %cst_83 = arith.constant 1.000000e+00 : f32
    %201 = vector.broadcast %cst_83 : f32 to vector<8x32xf32>
    %202 = arith.addf %201, %200 : vector<8x32xf32>
    %203 = arith.divf %201, %202 : vector<8x32xf32>
    %204 = vector.extract_strided_slice %197 {offsets = [0, 32], sizes = [8, 32], strides = [1, 1]} : vector<8x128xf32> to vector<8x32xf32>
    %205 = arith.negf %204 : vector<8x32xf32>
    %206 = math.exp %205 : vector<8x32xf32>
    %cst_84 = arith.constant 1.000000e+00 : f32
    %207 = vector.broadcast %cst_84 : f32 to vector<8x32xf32>
    %208 = arith.addf %207, %206 : vector<8x32xf32>
    %209 = arith.divf %207, %208 : vector<8x32xf32>
    %210 = vector.extract_strided_slice %197 {offsets = [0, 64], sizes = [8, 32], strides = [1, 1]} : vector<8x128xf32> to vector<8x32xf32>
    %211 = vector.extract_strided_slice %197 {offsets = [0, 96], sizes = [8, 32], strides = [1, 1]} : vector<8x128xf32> to vector<8x32xf32>
    %212 = arith.mulf %203, %211 : vector<8x32xf32>
    %213 = arith.addf %210, %212 : vector<8x32xf32>
    %214 = math.tanh %213 : vector<8x32xf32>
    %cst_85 = arith.constant 1.000000e+00 : f32
    %215 = vector.broadcast %cst_85 : f32 to vector<8x32xf32>
    %216 = arith.subf %215, %209 : vector<8x32xf32>
    %217 = arith.mulf %216, %214 : vector<8x32xf32>
    %218 = arith.mulf %209, %139 : vector<8x32xf32>
    %219 = arith.addf %217, %218 : vector<8x32xf32>
    %cst_86 = arith.constant 0.000000e+00 : f32
    %220 = vector.broadcast %cst_86 : f32 to vector<8x32xf32>
    %221 = arith.maximumf %219, %220 : vector<8x32xf32>
    %cst_87 = arith.constant dense<0.000000e+00> : vector<1x32xf32>
    %222 = tpu.matmul %12, %221, %cst_87 {dimension_numbers = #tpu.dot_dimension_numbers<[1], [0], [0], [1], [0, 0, 1, 1], [], []>} : vector<1x8xf32>, vector<8x32xf32>, vector<1x32xf32> -> vector<1x32xf32>
    %cst_88 = arith.constant 0.000000e+00 : f32
    %223 = vector.broadcast %cst_88 : f32 to vector<1x32xf32>
    %224 = arith.maximumf %222, %223 : vector<1x32xf32>
    %cst_89 = arith.constant dense<0.000000e+00> : vector<8x32xf32>
    %225 = tpu.matmul %221, %30, %cst_89 {dimension_numbers = #tpu.dot_dimension_numbers<[1], [0], [0], [1], [0, 0, 1, 1], [], []>} : vector<8x32xf32>, vector<32x32xf32>, vector<8x32xf32> -> vector<8x32xf32>
    %226 = vector.broadcast %32 : vector<1x32xf32> to vector<8x32xf32>
    %227 = arith.mulf %225, %226 : vector<8x32xf32>
    %cst_90 = arith.constant dense<0.000000e+00> : vector<8xf32>
    %228 = vector.multi_reduction <add>, %227, %cst_90 [1] : vector<8x32xf32> to vector<8xf32>
    %229 = vector.shape_cast %228 : vector<8xf32> to vector<8x1xf32>
    %cst_91 = arith.constant dense<0.000000e+00> : vector<1x32xf32>
    %230 = tpu.matmul %224, %30, %cst_91 {dimension_numbers = #tpu.dot_dimension_numbers<[1], [0], [0], [1], [0, 0, 1, 1], [], []>} : vector<1x32xf32>, vector<32x32xf32>, vector<1x32xf32> -> vector<1x32xf32>
    %231 = arith.mulf %230, %33 : vector<1x32xf32>
    %cst_92 = arith.constant dense<0.000000e+00> : vector<1xf32>
    %232 = vector.multi_reduction <add>, %231, %cst_92 [1] : vector<1x32xf32> to vector<1xf32>
    %233 = vector.shape_cast %232 : vector<1xf32> to vector<1x1xf32>
    %234 = vector.broadcast %233 : vector<1x1xf32> to vector<8x1xf32>
    %235 = arith.addf %229, %234 : vector<8x1xf32>
    %cst_93 = arith.constant 0.000000e+00 : f32
    %236 = vector.broadcast %cst_93 : f32 to vector<8x1xf32>
    %237 = arith.cmpf ogt, %235, %236 : vector<8x1xf32>
    %cst_94 = arith.constant 0.00999999977 : f32
    %238 = vector.broadcast %cst_94 : f32 to vector<8x1xf32>
    %239 = arith.mulf %238, %235 : vector<8x1xf32>
    %240 = arith.select %237, %235, %239 : vector<8x1xi1>, vector<8x1xf32>
    %cst_95 = arith.constant 5.000000e-01 : f32
    %241 = vector.broadcast %cst_95 : f32 to vector<8x1xf32>
    %242 = arith.cmpf ogt, %15, %241 : vector<8x1xf32>
    %cst_96 = arith.constant -1.000000e+30 : f32
    %243 = vector.broadcast %cst_96 : f32 to vector<8x1xf32>
    %244 = arith.select %242, %240, %243 : vector<8x1xi1>, vector<8x1xf32>
    %cst_97 = arith.constant dense<0xFF800000> : vector<1xf32>
    %245 = vector.multi_reduction <maximumf>, %244, %cst_97 [0] : vector<8x1xf32> to vector<1xf32>
    %246 = vector.shape_cast %245 : vector<1xf32> to vector<1x1xf32>
    %247 = vector.broadcast %246 : vector<1x1xf32> to vector<8x1xf32>
    %248 = arith.mulf %15, %247 : vector<8x1xf32>
    %cst_98 = arith.constant dense<0.000000e+00> : vector<8xf32>
    %249 = vector.multi_reduction <add>, %248, %cst_98 [1] : vector<8x1xf32> to vector<8xf32>
    %250 = vector.shape_cast %249 : vector<8xf32> to vector<8x1xf32>
    %251 = arith.subf %240, %250 : vector<8x1xf32>
    %252 = math.exp %251 : vector<8x1xf32>
    %253 = arith.mulf %15, %252 : vector<8x1xf32>
    %cst_99 = arith.constant dense<0.000000e+00> : vector<1xf32>
    %254 = vector.multi_reduction <add>, %253, %cst_99 [0] : vector<8x1xf32> to vector<1xf32>
    %255 = vector.shape_cast %254 : vector<1xf32> to vector<1x1xf32>
    %256 = vector.broadcast %255 : vector<1x1xf32> to vector<8x1xf32>
    %257 = arith.mulf %15, %256 : vector<8x1xf32>
    %cst_100 = arith.constant dense<0.000000e+00> : vector<8xf32>
    %258 = vector.multi_reduction <add>, %257, %cst_100 [1] : vector<8x1xf32> to vector<8xf32>
    %259 = vector.shape_cast %258 : vector<8xf32> to vector<8x1xf32>
    %cst_101 = arith.constant 1.000000e-16 : f32
    %260 = vector.broadcast %cst_101 : f32 to vector<8x1xf32>
    %261 = arith.addf %259, %260 : vector<8x1xf32>
    %262 = arith.divf %252, %261 : vector<8x1xf32>
    %263 = vector.broadcast %262 : vector<8x1xf32> to vector<8x32xf32>
    %264 = arith.mulf %263, %225 : vector<8x32xf32>
    %cst_102 = arith.constant dense<0.000000e+00> : vector<1x32xf32>
    %265 = tpu.matmul %12, %264, %cst_102 {dimension_numbers = #tpu.dot_dimension_numbers<[1], [0], [0], [1], [0, 0, 1, 1], [], []>} : vector<1x8xf32>, vector<8x32xf32>, vector<1x32xf32> -> vector<1x32xf32>
    %266 = arith.addf %265, %34 : vector<1x32xf32>
    %cst_103 = arith.constant 0.000000e+00 : f32
    %267 = vector.broadcast %cst_103 : f32 to vector<1x32xf32>
    %268 = arith.cmpf ogt, %266, %267 : vector<1x32xf32>
    %269 = math.exp %266 : vector<1x32xf32>
    %cst_104 = arith.constant 1.000000e+00 : f32
    %270 = vector.broadcast %cst_104 : f32 to vector<1x32xf32>
    %271 = arith.subf %269, %270 : vector<1x32xf32>
    %272 = arith.select %268, %266, %271 : vector<1x32xi1>, vector<1x32xf32>
    %273 = tpu.concatenate %272, %224 in 1 : vector<1x32xf32>, vector<1x32xf32> -> vector<1x64xf32>
    %cst_105 = arith.constant dense<0.000000e+00> : vector<1x128xf32>
    %274 = tpu.matmul %273, %41, %cst_105 {dimension_numbers = #tpu.dot_dimension_numbers<[1], [0], [0], [1], [0, 0, 1, 1], [], []>} : vector<1x64xf32>, vector<64x128xf32>, vector<1x128xf32> -> vector<1x128xf32>
    %275 = arith.addf %274, %42 : vector<1x128xf32>
    %276 = vector.extract_strided_slice %275 {offsets = [0, 0], sizes = [1, 32], strides = [1, 1]} : vector<1x128xf32> to vector<1x32xf32>
    %277 = arith.negf %276 : vector<1x32xf32>
    %278 = math.exp %277 : vector<1x32xf32>
    %cst_106 = arith.constant 1.000000e+00 : f32
    %279 = vector.broadcast %cst_106 : f32 to vector<1x32xf32>
    %280 = arith.addf %279, %278 : vector<1x32xf32>
    %281 = arith.divf %279, %280 : vector<1x32xf32>
    %282 = vector.extract_strided_slice %275 {offsets = [0, 32], sizes = [1, 32], strides = [1, 1]} : vector<1x128xf32> to vector<1x32xf32>
    %283 = arith.negf %282 : vector<1x32xf32>
    %284 = math.exp %283 : vector<1x32xf32>
    %cst_107 = arith.constant 1.000000e+00 : f32
    %285 = vector.broadcast %cst_107 : f32 to vector<1x32xf32>
    %286 = arith.addf %285, %284 : vector<1x32xf32>
    %287 = arith.divf %285, %286 : vector<1x32xf32>
    %288 = vector.extract_strided_slice %275 {offsets = [0, 64], sizes = [1, 32], strides = [1, 1]} : vector<1x128xf32> to vector<1x32xf32>
    %289 = vector.extract_strided_slice %275 {offsets = [0, 96], sizes = [1, 32], strides = [1, 1]} : vector<1x128xf32> to vector<1x32xf32>
    %290 = arith.mulf %281, %289 : vector<1x32xf32>
    %291 = arith.addf %288, %290 : vector<1x32xf32>
    %292 = math.tanh %291 : vector<1x32xf32>
    %cst_108 = arith.constant 1.000000e+00 : f32
    %293 = vector.broadcast %cst_108 : f32 to vector<1x32xf32>
    %294 = arith.subf %293, %287 : vector<1x32xf32>
    %295 = arith.mulf %294, %292 : vector<1x32xf32>
    %296 = arith.mulf %287, %224 : vector<1x32xf32>
    %297 = arith.addf %295, %296 : vector<1x32xf32>
    %cst_109 = arith.constant 0.000000e+00 : f32
    %298 = vector.broadcast %cst_109 : f32 to vector<1x32xf32>
    %299 = arith.maximumf %297, %298 : vector<1x32xf32>
    %cst_110 = arith.constant dense<0.000000e+00> : vector<1x32xf32>
    %300 = tpu.matmul %299, %30, %cst_110 {dimension_numbers = #tpu.dot_dimension_numbers<[1], [0], [0], [1], [0, 0, 1, 1], [], []>} : vector<1x32xf32>, vector<32x32xf32>, vector<1x32xf32> -> vector<1x32xf32>
    %301 = arith.mulf %300, %33 : vector<1x32xf32>
    %cst_111 = arith.constant dense<0.000000e+00> : vector<1xf32>
    %302 = vector.multi_reduction <add>, %301, %cst_111 [1] : vector<1x32xf32> to vector<1xf32>
    %303 = vector.shape_cast %302 : vector<1xf32> to vector<1x1xf32>
    %304 = vector.broadcast %303 : vector<1x1xf32> to vector<8x1xf32>
    %305 = arith.addf %229, %304 : vector<8x1xf32>
    %cst_112 = arith.constant 0.000000e+00 : f32
    %306 = vector.broadcast %cst_112 : f32 to vector<8x1xf32>
    %307 = arith.cmpf ogt, %305, %306 : vector<8x1xf32>
    %cst_113 = arith.constant 0.00999999977 : f32
    %308 = vector.broadcast %cst_113 : f32 to vector<8x1xf32>
    %309 = arith.mulf %308, %305 : vector<8x1xf32>
    %310 = arith.select %307, %305, %309 : vector<8x1xi1>, vector<8x1xf32>
    %cst_114 = arith.constant 5.000000e-01 : f32
    %311 = vector.broadcast %cst_114 : f32 to vector<8x1xf32>
    %312 = arith.cmpf ogt, %15, %311 : vector<8x1xf32>
    %cst_115 = arith.constant -1.000000e+30 : f32
    %313 = vector.broadcast %cst_115 : f32 to vector<8x1xf32>
    %314 = arith.select %312, %310, %313 : vector<8x1xi1>, vector<8x1xf32>
    %cst_116 = arith.constant dense<0xFF800000> : vector<1xf32>
    %315 = vector.multi_reduction <maximumf>, %314, %cst_116 [0] : vector<8x1xf32> to vector<1xf32>
    %316 = vector.shape_cast %315 : vector<1xf32> to vector<1x1xf32>
    %317 = vector.broadcast %316 : vector<1x1xf32> to vector<8x1xf32>
    %318 = arith.mulf %15, %317 : vector<8x1xf32>
    %cst_117 = arith.constant dense<0.000000e+00> : vector<8xf32>
    %319 = vector.multi_reduction <add>, %318, %cst_117 [1] : vector<8x1xf32> to vector<8xf32>
    %320 = vector.shape_cast %319 : vector<8xf32> to vector<8x1xf32>
    %321 = arith.subf %310, %320 : vector<8x1xf32>
    %322 = math.exp %321 : vector<8x1xf32>
    %323 = arith.mulf %15, %322 : vector<8x1xf32>
    %cst_118 = arith.constant dense<0.000000e+00> : vector<1xf32>
    %324 = vector.multi_reduction <add>, %323, %cst_118 [0] : vector<8x1xf32> to vector<1xf32>
    %325 = vector.shape_cast %324 : vector<1xf32> to vector<1x1xf32>
    %326 = vector.broadcast %325 : vector<1x1xf32> to vector<8x1xf32>
    %327 = arith.mulf %15, %326 : vector<8x1xf32>
    %cst_119 = arith.constant dense<0.000000e+00> : vector<8xf32>
    %328 = vector.multi_reduction <add>, %327, %cst_119 [1] : vector<8x1xf32> to vector<8xf32>
    %329 = vector.shape_cast %328 : vector<8xf32> to vector<8x1xf32>
    %cst_120 = arith.constant 1.000000e-16 : f32
    %330 = vector.broadcast %cst_120 : f32 to vector<8x1xf32>
    %331 = arith.addf %329, %330 : vector<8x1xf32>
    %332 = arith.divf %322, %331 : vector<8x1xf32>
    %333 = vector.broadcast %332 : vector<8x1xf32> to vector<8x32xf32>
    %334 = arith.mulf %333, %225 : vector<8x32xf32>
    %cst_121 = arith.constant dense<0.000000e+00> : vector<1x32xf32>
    %335 = tpu.matmul %12, %334, %cst_121 {dimension_numbers = #tpu.dot_dimension_numbers<[1], [0], [0], [1], [0, 0, 1, 1], [], []>} : vector<1x8xf32>, vector<8x32xf32>, vector<1x32xf32> -> vector<1x32xf32>
    %336 = arith.addf %335, %34 : vector<1x32xf32>
    %cst_122 = arith.constant 0.000000e+00 : f32
    %337 = vector.broadcast %cst_122 : f32 to vector<1x32xf32>
    %338 = arith.cmpf ogt, %336, %337 : vector<1x32xf32>
    %339 = math.exp %336 : vector<1x32xf32>
    %cst_123 = arith.constant 1.000000e+00 : f32
    %340 = vector.broadcast %cst_123 : f32 to vector<1x32xf32>
    %341 = arith.subf %339, %340 : vector<1x32xf32>
    %342 = arith.select %338, %336, %341 : vector<1x32xi1>, vector<1x32xf32>
    %343 = tpu.concatenate %342, %299 in 1 : vector<1x32xf32>, vector<1x32xf32> -> vector<1x64xf32>
    %cst_124 = arith.constant dense<0.000000e+00> : vector<1x128xf32>
    %344 = tpu.matmul %343, %41, %cst_124 {dimension_numbers = #tpu.dot_dimension_numbers<[1], [0], [0], [1], [0, 0, 1, 1], [], []>} : vector<1x64xf32>, vector<64x128xf32>, vector<1x128xf32> -> vector<1x128xf32>
    %345 = arith.addf %344, %42 : vector<1x128xf32>
    %346 = vector.extract_strided_slice %345 {offsets = [0, 0], sizes = [1, 32], strides = [1, 1]} : vector<1x128xf32> to vector<1x32xf32>
    %347 = arith.negf %346 : vector<1x32xf32>
    %348 = math.exp %347 : vector<1x32xf32>
    %cst_125 = arith.constant 1.000000e+00 : f32
    %349 = vector.broadcast %cst_125 : f32 to vector<1x32xf32>
    %350 = arith.addf %349, %348 : vector<1x32xf32>
    %351 = arith.divf %349, %350 : vector<1x32xf32>
    %352 = vector.extract_strided_slice %345 {offsets = [0, 32], sizes = [1, 32], strides = [1, 1]} : vector<1x128xf32> to vector<1x32xf32>
    %353 = arith.negf %352 : vector<1x32xf32>
    %354 = math.exp %353 : vector<1x32xf32>
    %cst_126 = arith.constant 1.000000e+00 : f32
    %355 = vector.broadcast %cst_126 : f32 to vector<1x32xf32>
    %356 = arith.addf %355, %354 : vector<1x32xf32>
    %357 = arith.divf %355, %356 : vector<1x32xf32>
    %358 = vector.extract_strided_slice %345 {offsets = [0, 64], sizes = [1, 32], strides = [1, 1]} : vector<1x128xf32> to vector<1x32xf32>
    %359 = vector.extract_strided_slice %345 {offsets = [0, 96], sizes = [1, 32], strides = [1, 1]} : vector<1x128xf32> to vector<1x32xf32>
    %360 = arith.mulf %351, %359 : vector<1x32xf32>
    %361 = arith.addf %358, %360 : vector<1x32xf32>
    %362 = math.tanh %361 : vector<1x32xf32>
    %cst_127 = arith.constant 1.000000e+00 : f32
    %363 = vector.broadcast %cst_127 : f32 to vector<1x32xf32>
    %364 = arith.subf %363, %357 : vector<1x32xf32>
    %365 = arith.mulf %364, %362 : vector<1x32xf32>
    %366 = arith.mulf %357, %299 : vector<1x32xf32>
    %367 = arith.addf %365, %366 : vector<1x32xf32>
    %cst_128 = arith.constant 0.000000e+00 : f32
    %368 = vector.broadcast %cst_128 : f32 to vector<1x32xf32>
    %369 = arith.maximumf %367, %368 : vector<1x32xf32>
    %cst_129 = arith.constant dense<0.000000e+00> : vector<1x4xf32>
    %370 = tpu.matmul %369, %35, %cst_129 {dimension_numbers = #tpu.dot_dimension_numbers<[1], [0], [0], [1], [0, 0, 1, 1], [], []>} : vector<1x32xf32>, vector<32x4xf32>, vector<1x4xf32> -> vector<1x4xf32>
    %371 = arith.addf %370, %36 : vector<1x4xf32>
    %372 = arith.negf %371 : vector<1x4xf32>
    %373 = math.exp %372 : vector<1x4xf32>
    %cst_130 = arith.constant 1.000000e+00 : f32
    %374 = vector.broadcast %cst_130 : f32 to vector<1x4xf32>
    %375 = arith.addf %374, %373 : vector<1x4xf32>
    %376 = arith.divf %374, %375 : vector<1x4xf32>
    %c0_131 = arith.constant 0 : index
    %c0_132 = arith.constant 0 : index
    %c0_133 = arith.constant 0 : index
    %377 = vector.load %arg9[%c0_131, %c0_132, %c0_133] : memref<1x1x4xf32, #tpu.memory_space<vmem>>, vector<1x1x4xf32>
    %378 = vector.shape_cast %377 : vector<1x1x4xf32> to vector<1x4xf32>
    %379 = vector.shape_cast %376 : vector<1x4xf32> to vector<1x1x4xf32>
    tpu.vector_store %arg9[%c0_131, %c0_132, %c0_133], %379 {strides = array<i32>} : memref<1x1x4xf32, #tpu.memory_space<vmem>>, vector<1x1x4xf32>,
    return
  }
  func.func @transform_0(%arg0: i32) -> (i32, i32, i32) {
    %c0_i32 = arith.constant 0 : i32
    %c0_i32_0 = arith.constant 0 : i32
    %c0_i32_1 = arith.constant 0 : i32
    return %arg0, %c0_i32, %c0_i32_0 : i32, i32, i32
  }
  func.func @transform_1(%arg0: i32) -> (i32, i32, i32) {
    %c0_i32 = arith.constant 0 : i32
    %c0_i32_0 = arith.constant 0 : i32
    %c0_i32_1 = arith.constant 0 : i32
    return %arg0, %c0_i32, %c0_i32_0 : i32, i32, i32
  }
  func.func @transform_2(%arg0: i32) -> (i32, i32, i32) {
    %c0_i32 = arith.constant 0 : i32
    %c0_i32_0 = arith.constant 0 : i32
    %c0_i32_1 = arith.constant 0 : i32
    return %arg0, %c0_i32, %c0_i32_0 : i32, i32, i32
  }
  func.func @transform_3(%arg0: i32) -> (i32, i32, i32) {
    %c0_i32 = arith.constant 0 : i32
    %c0_i32_0 = arith.constant 0 : i32
    %c0_i32_1 = arith.constant 0 : i32
    return %arg0, %c0_i32, %c0_i32_0 : i32, i32, i32
  }
  func.func @transform_4(%arg0: i32) -> (i32, i32, i32) {
    %c0_i32 = arith.constant 0 : i32
    %c0_i32_0 = arith.constant 0 : i32
    %c0_i32_1 = arith.constant 0 : i32
    return %arg0, %c0_i32, %c0_i32_0 : i32, i32, i32
  }
  func.func @transform_5(%arg0: i32) -> (i32, i32, i32) {
    %c0_i32 = arith.constant 0 : i32
    %c0_i32_0 = arith.constant 0 : i32
    %c0_i32_1 = arith.constant 0 : i32
    return %arg0, %c0_i32, %c0_i32_0 : i32, i32, i32
  }
  func.func @transform_6(%arg0: i32) -> (i32, i32) {
    %c0_i32 = arith.constant 0 : i32
    %c0_i32_0 = arith.constant 0 : i32
    %c0_i32_1 = arith.constant 0 : i32
    return %c0_i32, %c0_i32_0 : i32, i32
  }
  func.func @transform_7(%arg0: i32) -> (i32, i32) {
    %c0_i32 = arith.constant 0 : i32
    %c0_i32_0 = arith.constant 0 : i32
    %c0_i32_1 = arith.constant 0 : i32
    return %c0_i32, %c0_i32_0 : i32, i32
  }
  func.func @transform_8(%arg0: i32) -> (i32, i32, i32) {
    %c0_i32 = arith.constant 0 : i32
    %c0_i32_0 = arith.constant 0 : i32
    %c0_i32_1 = arith.constant 0 : i32
    return %arg0, %c0_i32, %c0_i32_0 : i32, i32, i32
  }
}

</mosaic_0001>

<bundles_post_ra>
// kernel: tpu_custom_call.1
= control target key start
LH: loop header
LB: loop body
LE: loop exit
PB: predicated region body
PF: predicated region fallthrough
CT: control target
= control target key end

     0   :  { %13 = vsyncpa [#allocation3], 0  ;;  %s3781_s0 = inlined_call_operand.vmem [shape: f32[2,8,16], index: 0, kind: input, shape index: {}]   ;;  %s3782_s1 = inlined_call_operand.vmem [shape: f32[2,16,8], index: 1, kind: input, shape index: {}]   ;;  %s3783_s2 = inlined_call_operand.vmem [shape: bf16[2,32,8], index: 2, kind: input, shape index: {}]   ;;  %s3784_s3 = inlined_call_operand.vmem [shape: bf16[2,8,16], index: 3, kind: input, shape index: {}]   ;;  %s3785_s4 = inlined_call_operand.vmem [shape: bf16[2,1,8], index: 4, kind: input, shape index: {}]   ;;  %s3786_s5 = inlined_call_operand.vmem [shape: bf16[2,8,1], index: 5, kind: input, shape index: {}]   ;;  %s3787_s6 = inlined_call_operand.vmem [shape: f32[232,32], index: 6, kind: input, shape index: {}]   ;;  %s3788_s7 = inlined_call_operand.vmem [shape: f32[216,128], index: 7, kind: input, shape index: {}]   ;;  %s3789_s8 = inlined_call_operand.hbm [shape: f32[2,1,4], index: 8, kind: output, shape index: {}]  }
   0x1   :  { %15 = vsyncpa [#allocation3 + $0x1], 0  ;;  %s3185_s27 = smov 0   ;;  %s3187_s28 = smov 0  }
   0x2   :  { %s3189_s29 = smov 0   ;;  %s3191_s30 = smov 0  }
   0x3 LB: > { %s3206_s9 = sadd.s32 4294967295, %s3130_s30   ;;  %s2487_s10 = sadd.s32 4294967294, %s3130_s30   ;;  %s3130_s30 = sphi %s3191_s30, %s3795_s30   ;;  %s3126_s29 = sphi %s3189_s29, %s3794_s29   ;;  %s3122_s28 = sphi %s3187_s28, %s3793_s28   ;;  %s3118_s27 = sphi %s3185_s27, %s3792_s27  }
   0x4   : > { %s3210_s11 = sadd.s32 1, %s3130_s30   ;;  %s226_s12 = sadd.s32 1, %s3126_s29 }
   0x5   : > { %s223_s13 = ssub.s32 %s3130_s30, %s3210_s11  ;;  %p236_p0 = scmp.ne.s32.totalorder %s3126_s29, %s3122_s28 }
   0x6   : > { %p224_p1 = scmp.eq.s32.totalorder %s223_s13, 0  ;;  %p237_p2 = scmp.eq.s32.totalorder %s3206_s9, 1 }
   0x7   : > { %p242_p3 = scmp.ne.s32.totalorder %s3122_s28, %s3118_s27  ;;  %p243_p4 = scmp.eq.s32.totalorder %s2487_s10, 1 }
   0x8   : > { %s3221_s14 = scalar_select %p224_p1, %s3126_s29, %s226_s12  }
   0x9   : > { %p3223_p5 = por %p237_p2, %p236_p0  ;;  %p3227_p6 = por %p243_p4, %p242_p3 }
   0xa   : > { %p2490_p7 = scmp.ge.s32.totalorder %s3130_s30, 1  ;;  %p310_p8 = scmp.lt.s32.totalorder %s3130_s30, 3 }
   0xc   : > { %p311_p9 = pnand %p2490_p7, %p310_p8 }
   0xd   : > { %v405_v0 = vld [vmem:[%s3787_s6] sm:$0xff] (!%p311_p9)  ;;  %v406_v1 = vld [vmem:[%s3787_s6 + $0x8] sm:$0xff] (!%p311_p9)  ;;  %p363_p10 = scmp.lt.s32.totalorder (!%p311_p9), %s3206_s9, 1  ;;  %v3132_v2 = vmov (!%p311_p9), 0.0|0.0   ;;  %vm3133_vm0 = vmmov (!%p311_p9), 0   ;;  %v3134_v4 = vmov (!%p311_p9), 0.0   ;;  %v739_v33 = vlaneseq (!%p311_p9) }
   0xe   : > { %314 = sbr.rel (%p311_p9) target bundleno = 7433 (0x1d09), region = 52  ;;  %2858 = vmatprep.subr.bf16.mxu0 (!%p311_p9), %v3132_v2  ;;  %v2859_v3 = vpack.c.bf16 (!%p311_p9), %v406_v1, %v405_v0  ;;  %2655 = vmatprep.mubr.msk.f32.mxu0 (!%p311_p9), %vm3133_vm0, %v3134_v4  ;;  %vm465_vm1 = vcmask (!%p311_p9), 130048   ;;  %vm542_vm2 = vcmask (!%p311_p9), 64512   ;;  %v414_v9 = vld [vmem:[%s3787_s6 + $0x48] sm:$0xff] (!%p311_p9)  ;;  %s3135_s23 = smov (!%p311_p9), 32   ;;  %v415_v10 = vld [vmem:[%s3787_s6 + $0x50] sm:$0xff] (!%p311_p9) }
   0xf   : > { %v2869_v12 = vpack.c.bf16 (!%p311_p9), %v415_v10, %v414_v9  ;;  %v416_v13 = vld [vmem:[%s3787_s6 + $0x58] sm:$0xff] (!%p311_p9)  ;;  %v417_v14 = vld [vmem:[%s3787_s6 + $0x60] sm:$0xff] (!%p311_p9)  ;;  %v2498_v16 = vld [vmem:[%s3787_s6 + $0x10] ss:$0 sm:$0xff] (!%p311_p9)  ;;  %v3314_v34 = vshrl.u32 (!%p311_p9), %v739_v33, 7  ;;  %vm648_vm4 = vcmask (!%p311_p9), 261120  }
  0x10   : > { %2860 = vmatpush3.bf16.msra.mxu0 (!%p311_p9), %v2859_v3  ;;  %v2873_v15 = vpack.c.bf16 (!%p311_p9), %v417_v14, %v416_v13  ;;  %v408_v20 = vld [vmem:[%s3787_s6 + $0x18] sm:$0xff] (!%p311_p9)  ;;  %v409_v21 = vld [vmem:[%s3787_s6 + $0x20] sm:$0xff] (!%p311_p9)  ;;  %v410_v24 = vld [vmem:[%s3787_s6 + $0x28] sm:$0xff] (!%p311_p9)  ;;  %vm651_vm5 = vcmask (!%p311_p9), 326656   ;;  %vm997_vm13 = vcmask (!%p311_p9), 523264   ;;  %s3136_s12 = smov (!%p311_p9), 64  }
  0x11   : > { %2870 = vmatprep.subr.bf16.mxu0 (!%p311_p9), %v2869_v12  ;;  %v411_v25 = vld [vmem:[%s3787_s6 + $0x30] sm:$0xff] (!%p311_p9)  ;;  %v2861_v27 = vpack.c.bf16 (!%p311_p9), %v409_v21, %v408_v20  ;;  %v412_v32 = vld [vmem:[%s3787_s6 + $0x38] sm:$0xff] (!%p311_p9)  ;;  %v753_v36 = vsub.s32 (!%p311_p9), 1, %v3314_v34  ;;  %v413_v37 = vld [vmem:[%s3787_s6 + $0x40] sm:$0x3] (!%p311_p9)  ;;  %v3332_v49 = vsub.s32 (!%p311_p9), 0, %v3314_v34 }
  0x12   : > { %v2865_v30 = vpack.c.bf16 (!%p311_p9), %v411_v25, %v410_v24  ;;  %s2538_s17 = sshll.u32 (!%p311_p9), %s3206_s9, 4 }
  0x13   : > { %v754_v41 = vrot.slane (!%p311_p9), %v413_v37, %v753_v36  ;;  %v742_v53 = vrot.slane (!%p311_p9), %v413_v37, %v3332_v49 }
  0x15   : > { %s3244_s21 = scalar_select %p363_p10, %s3206_s9, 1 }
  0x16   : > { %s3139_s9 = smov [#allocation2]  }
  0x17   : > { %s2491_s22 = sshll.u32 %s3244_s21, 3  ;;  %s2541_s26 = sshll.u32 %s3244_s21, 4 }
  0x18   : > { %s366_s25 = scalar_lea.vmem %s3781_s0, %s2491_s22  ;;  %s376_s13 = scalar_lea.vmem %s3783_s2, %s2541_s26 }
  0x19   : > { %v388_v5 = vld [vmem:[%s366_s25] sm:$0xff]  ;;  %s371_s19 = scalar_lea.vmem %s3782_s1, %s2541_s26  ;;  %v2551_v22 = vld [vmem:[%s376_s13 + $0x8] sm:$0xff]   ;;  %s2496_s22 = sshll.u32 %s3244_s21, 2 }
  0x1a   : > { %2656 = vmatmul.mubr.msk.f32.vlgmr.msra.gmra.mrb[0].mxu0 %vm465_vm1, %v388_v5  ;;  %v3255_v6 = vld [vmem:[%s376_s13] sm:$0xff]   ;;  %v390_v11 = vld [vmem:[%s371_s19 + $0x8] sm:$0xff]  ;;  %v3297_v29 = vunpack.c.l.bf16 %v2551_v22  ;;  %v3301_v31 = vunpack.c.h.bf16 %v2551_v22  ;;  %s380_s10 = scalar_lea.vmem %s3784_s3, %s2496_s22  ;;  %s383_s24 = scalar_lea.vmem %s3785_s4, %s3244_s21 }
  0x1b   : > { %v2545_v7 = vunpack.c.l.bf16 %v3255_v6  ;;  %v389_v8 = vld [vmem:[%s371_s19] sm:$0xff]  ;;  %2872 = vmatpush3.bf16.msra.mxu0 %v2869_v12  ;;  %v2546_v26 = vunpack.c.h.bf16 %v3255_v6  ;;  %s387_s18 = scalar_lea.vmem %s3786_s5, %s2496_s22  ;;  %s361_s26 = sand.u32 1, %s3122_s28  }
  0x1c   : > { %642 = vrot.lane.b32.xlu0 %v389_v8, %s3135_s23  ;;  %2874 = vmatprep.subr.bf16.mxu0 %v2873_v15  ;;  %vm771_vm9 = vcmp.gt.f32.partialorder %v3297_v29, 0.5  ;;  %vm772_vm10 = vcmp.gt.f32.partialorder %v3301_v31, 0.5  ;;  %s362_s13 = scalar_lea.vmem [#allocation2], %s361_s26  ;;  %s3739_s22 = scalar_lea.hbm %s3789_s8, %s2538_s17 }
  0x1d   : > { %2660 = vmatprep.mubr.msk.f32.mxu1 %vm542_vm2, %v2545_v7  ;;  %s3072_s20 = sshll.u32 %s3139_s9, 4  ;;  %s3073_s20 = int_to_ptr.vmem [resolvable:$false] %s3072_s20 }
  0x1f   : > { %2876 = vmatpush3.bf16.msra.mxu0 %v2873_v15 }
  0x20   : > { %644 = vrot.lane.b32.xlu0 %v390_v11, %s3135_s23  ;;  %2892 = vmatprep.subr.bf16.mxu0 %v3132_v2 }
  0x8e   : > { %v643_v35 = vpop.permute.xlu0 %642 }
  0x92   : > { %v645_v38 = vpop.permute.xlu0 %644 }
  0xed   : > { %v535_v17 = vpop.f32.mrb[0].mxu0 }
  0xee   : > { %v536_v18 = vadd.f32 %v2498_v16, %v535_v17  ;;  %v2657_v19 = vpop.f32.mrb[1].mxu0 }
  0xf0   : > { %v540_v23 = vmul.f32 0.01, %v536_v18  ;;  %vm539_vm3 = vcmp.gt.f32.partialorder %v536_v18, 0.0 }
  0xf2   : > { %v3295_v28 = vsel %vm539_vm3, %v536_v18, %v540_v23  ;;  %vm1759_vm3 = vcmask 253952  }
  0xf3   : > { %2658 = vmatprep.subr.mxu1 %v3295_v28 }
  0xf4   : > { %2659 = vmatpush3.msra.mxu1 %v3295_v28 }
  0xf5   : > { %2661 = vmatmul.mubr.msk.f32.vlgmr.msra.gmra.mrb[0].mxu1 %vm542_vm2, %v2546_v26  ;;  %2862 = vmatprep.subr.bf16.mxu1 %v2861_v27 }
  0xf6   : > { %2864 = vmatpush3.bf16.msra.mxu1 %v2861_v27  ;;  %2663 = vmatprep.mubr.msk.f32.mxu1 %vm542_vm2, %v3297_v29 }
  0xf7   : > { %2866 = vmatprep.subr.bf16.mxu1 %v2865_v30 }
  0xf9   : > { %2664 = vmatmul.mubr.msk.f32.gmra.mrb[2].mxu1 %vm542_vm2, %v3301_v31 }
  0xfa   : > { %2868 = vmatpush3.bf16.msra.mxu1 %v2865_v30 }
  0xfb   : > { %2674 = vmatprep.subr.mxu1 %v412_v32 }
  0xfe   : > { %2675 = vmatpush3.msra.mxu1 %v412_v32 }
  0xff   : > { %2877 = vmatprep.subr.bf16.mxu1 %v3132_v2 }
 0x1c8   : > { %v2662_v39 = vpop.f32.mrb[0].mxu1 }
 0x1c9   : > { %v621_v40 = vpop.f32.mrb[1].mxu1  ;;  %v650_v43 = vsel %vm648_vm4, %v2662_v39, %v645_v38 }
 0x1ca   : > { %v649_v42 = vsel %vm648_vm4, %v621_v40, %v643_v35  ;;  %2687 = vmatprep.mubr.msk.f32.mxu0 %vm648_vm4, %v621_v40 }
 0x1cb   : > { %2676 = vmatprep.mubr.msk.f32.mxu1 %vm651_vm5, %v649_v42  ;;  %2688 = vmatmul.mubr.msk.f32.vlgmr.msra.gmra.mrb[2].mxu0 %vm648_vm4, %v2662_v39 }
 0x1cc   : > { %2677 = vmatmul.mubr.msk.f32.vlgmr.msra.gmra.mrb[4].mxu1 %vm651_vm5, %v650_v43  ;;  %v2665_v44 = vpop.f32.mrb[2].mxu1  ;;  %2724 = vmatprep.mubr.msk.f32.mxu0 %vm3133_vm0, %v3134_v4 }
 0x1cd   : > { %v756_v45 = vmul.f32 %v2665_v44, %v754_v41  ;;  %v631_v46 = vpop.f32.mrb[3].mxu1  ;;  %2694 = vmatprep.mubr.msk.f32.mxu1 %vm3133_vm0, %v3134_v4 }
 0x1ce   : > { %v755_v47 = vmul.f32 %v754_v41, %v631_v46 }
 0x1cf   : > { %v760_v63 = vsel %vm648_vm4, %v756_v45, 0.0 }
 0x1d0   : > { %v757_v48 = vsel %vm648_vm4, %v755_v47, 0.0 }
 0x1d1   : > { %758 = vadd.xlane.f32.xlu0 %v757_v48 }
 0x25e   : > { %v759_v1 = vpop.xlane.xlu0 %758 }
 0x29e   : > { %v3334_v50 = vpop.f32.mrb[2].mxu0 }
 0x29f   : > { %v2678_v51 = vpop.f32.mrb[4].mxu1  ;;  %v3336_v52 = vpop.f32.mrb[3].mxu0 }
 0x2a0   : > { %vm734_vm6 = vcmp.gt.f32.partialorder %v2678_v51, 0.0  ;;  %v736_v54 = vmul.f32 0.01, %v2678_v51  ;;  %v724_v55 = vpop.f32.mrb[5].mxu1 }
 0x2a1   : > { %vm733_vm7 = vcmp.gt.f32.partialorder %v724_v55, 0.0  ;;  %v735_v56 = vmul.f32 0.01, %v724_v55 }
 0x2a2   : > { %v738_v57 = vsel %vm734_vm6, %v2678_v51, %v736_v54 }
 0x2a3   : > { %v744_v58 = vmul.f32 %v742_v53, %v738_v57  ;;  %v737_v59 = vsel %vm733_vm7, %v724_v55, %v735_v56  ;;  %vm1773_vm7 = vcmask 7168  }
 0x2a4   : > { %v743_v61 = vmul.f32 %v742_v53, %v737_v59 }
 0x2a5   : > { %v748_v60 = vsel %vm648_vm4, %v744_v58, 0.0 }
 0x2a6   : > { %749 = vadd.xlane.f32.xlu1 %v748_v60  ;;  %v745_v62 = vsel %vm648_vm4, %v743_v61, 0.0 }
 0x2aa   : > { %746 = vadd.xlane.f32.xlu1 %v745_v62 }
 0x2ae   : > { %761 = vadd.xlane.f32.xlu1 %v760_v63 }
 0x333   : > { %v750_v0 = vpop.xlane.xlu1 %749 }
 0x337   : > { %v747_v3 = vpop.xlane.xlu1 %746 }
 0x338   : > { %v763_v5 = vadd.f32 %v759_v1, %v747_v3 }
 0x33a   : > { %vm765_vm8 = vcmp.gt.f32.partialorder %v763_v5, 0.0  ;;  %v767_v8 = vmul.f32 0.01, %v763_v5 }
 0x33b   : > { %v762_v9 = vpop.xlane.xlu1 %761 }
 0x33c   : > { %v769_v10 = vsel %vm765_vm8, %v763_v5, %v767_v8  ;;  %v764_v11 = vadd.f32 %v762_v9, %v750_v0 }
 0x33d   : > { %v773_v13 = vsel %vm771_vm9, %v769_v10, -1e+30 }
 0x33e   : > { %vm766_vm11 = vcmp.gt.f32.partialorder %v764_v11, 0.0  ;;  %v768_v12 = vmul.f32 0.01, %v764_v11  ;;  %v775_v16 = vsel %vm542_vm2, %v773_v13, -inf }
 0x340   : > { %v770_v14 = vsel %vm766_vm11, %v764_v11, %v768_v12 }
 0x341   : > { %v774_v15 = vsel %vm772_vm10, %v770_v14, -1e+30 }
 0x342   : > { %v776_v17 = vsel %vm542_vm2, %v774_v15, -inf  ;;  %v437_v15 = vld [vmem:[%s3788_s7 + $0x18] sm:$0xff] }
 0x343   : > { %v777_v18 = vmax.f32 %v775_v16, %v776_v17  ;;  %v438_v17 = vld [vmem:[%s3788_s7 + $0x20] sm:$0xff] }
 0x345   : > { %v778_v19 = vrot.slane %v777_v18, 4 }
 0x347   : > { %v779_v20 = vmax.f32 %v777_v18, %v778_v19  ;;  %v439_v18 = vld [vmem:[%s3788_s7 + $0x28] sm:$0xff] }
 0x348   : > { %v2887_v19 = vpack.c.bf16 %v439_v18, %v438_v17 }
 0x349   : > { %v780_v21 = vrot.slane %v779_v20, 2 }
 0x34b   : > { %v781_v22 = vmax.f32 %v779_v20, %v780_v21  ;;  %v440_v20 = vld [vmem:[%s3788_s7 + $0x30] sm:$0xff]  ;;  %v441_v21 = vld [vmem:[%s3788_s7 + $0x38] sm:$0xff] }
 0x34d   : > { %v782_v23 = vrot.slane %v781_v22, 1 }
 0x34f   : > { %v783_v24 = vmax.f32 %v781_v22, %v782_v23  ;;  %v2890_v22 = vpack.c.bf16 %v441_v21, %v440_v20  ;;  %v2508_v23 = vld [vmem:[%s3787_s6 + $0x68] ss:$0 sm:$0xff] }
 0x351   : > { %v784_v25 = vmul.f32 %v3297_v29, %v783_v24  ;;  %v785_v30 = vmul.f32 %v3301_v31, %v783_v24 }
 0x353   : > { %v786_v27 = vsel %vm542_vm2, %v784_v25, 0.0  ;;  %v789_v32 = vsel %vm542_vm2, %v785_v30, 0.0 }
 0x354   : > { %787 = vadd.xlane.f32.xlu1 %v786_v27 }
 0x358   : > { %790 = vadd.xlane.f32.xlu1 %v789_v32 }
 0x3e1   : > { %v788_v33 = vpop.xlane.xlu1 %787 }
 0x3e2   : > { %v792_v35 = vsub.f32 %v769_v10, %v788_v33  ;;  %v3372_v10 = vld [vmem:[%s380_s10] sm:$0xf]  ;;  %s3137_s10 = smov 96  }
 0x3e3   : > { %v400_v12 = vunpack.c.l.bf16 %v3372_v10  ;;  %v445_v10 = vld [vmem:[%s3788_s7 + $0x58] sm:$0xff] }
 0x3e4   : > { %v794_v37 = vmul.f32 1.442695, %v792_v35 }
 0x3e5   : > { %v791_v38 = vpop.xlane.xlu1 %790 }
 0x3e6   : > { %3008 = vpow2.f32 %v794_v37  ;;  %v793_v39 = vsub.f32 %v770_v14, %v791_v38  ;;  %v436_v14 = vld [vmem:[%s3788_s7 + $0x10] sm:$0xff] }
 0x3e7   : > { %v2884_v16 = vpack.c.bf16 %v437_v15, %v436_v14 }
 0x3e8   : > { %v796_v40 = vmul.f32 1.442695, %v793_v39  ;;  %v2511_v39 = vld [vmem:[%s3788_s7 + $0x40] ss:$0 sm:$0xff] }
 0x3ea   : > { %3010 = vpow2.f32 %v796_v40 }
 0x3f0   : > { %v3009_v41 = vpop.eup %3008 }
 0x3f1   : > { %v798_v42 = vmul.f32 %v3009_v41, %v3297_v29 }
 0x3f3   : > { %v800_v45 = vsel %vm542_vm2, %v798_v42, 0.0 }
 0x3f4   : > { %v3011_v43 = vpop.eup %3010 }
 0x3f5   : > { %v799_v44 = vmul.f32 %v3011_v43, %v3301_v31 }
 0x3f7   : > { %v801_v46 = vsel %vm542_vm2, %v799_v44, 0.0 }
 0x3f8   : > { %v802_v47 = vadd.f32 %v801_v46, %v800_v45 }
 0x3fa   : > { %v803_v48 = vrot.slane %v802_v47, 4 }
 0x3fc   : > { %v804_v51 = vadd.f32 %v803_v48, %v802_v47 }
 0x3fe   : > { %v805_v53 = vrot.slane %v804_v51, 2 }
 0x400   : > { %v806_v54 = vadd.f32 %v805_v53, %v804_v51 }
 0x402   : > { %v807_v55 = vrot.slane %v806_v54, 1 }
 0x404   : > { %v808_v56 = vadd.f32 %v807_v55, %v806_v54  ;;  %v419_v54 = vld [vmem:[%s3787_s6 + $0x70] sm:$0xff]  ;;  %v420_v55 = vld [vmem:[%s3787_s6 + $0x78] sm:$0xff] }
 0x406   : > { %v809_v57 = vmul.f32 %v3297_v29, %v808_v56  ;;  %v810_v59 = vmul.f32 %v3301_v31, %v808_v56  ;;  %v421_v56 = vld [vmem:[%s3787_s6 + $0x80] sm:$0xff] }
 0x408   : > { %v811_v58 = vsel %vm542_vm2, %v809_v57, 0.0  ;;  %v814_v60 = vsel %vm542_vm2, %v810_v59, 0.0  ;;  %v2893_v57 = vpack.c.bf16 %v420_v55, %v419_v54 }
 0x409   : > { %812 = vadd.xlane.f32.xlu1 %v811_v58  ;;  %v422_v58 = vld [vmem:[%s3787_s6 + $0x88] sm:$0xff] }
 0x40a   : > { %2894 = vmatpush3.bf16.msra.mxu0 %v2893_v57  ;;  %v2896_v59 = vpack.c.bf16 %v422_v58, %v421_v56 }
 0x40b   : > { %2895 = vmatprep.subr.bf16.mxu0 %v3132_v2 }
 0x40d   : > { %815 = vadd.xlane.f32.xlu1 %v814_v60 }
 0x40e   : > { %2897 = vmatpush3.bf16.msra.mxu0 %v2896_v59 }
 0x41e   : > { %989 = vrot.lane.b32.xlu1 %v3295_v28, %s3135_s23 }
 0x496   : > { %v813_v61 = vpop.xlane.xlu1 %812 }
 0x497   : > { %v817_v62 = vadd.f32 1e-16, %v813_v61 }
 0x499   : > { %3012 = vrcp.f32 %v817_v62 }
 0x49a   : > { %v816_v63 = vpop.xlane.xlu1 %815 }
 0x49b   : > { %v818_v0 = vadd.f32 1e-16, %v816_v63 }
 0x49d   : > { %3014 = vrcp.f32 %v818_v0 }
 0x49e   : > { %v990_v35 = vpop.permute.xlu1 %989 }
 0x4a3   : > { %v3013_v1 = vpop.eup %3012 }
 0x4a4   : > { %v820_v3 = vmul.f32 %v3013_v1, %v3009_v41 }
 0x4a6   : > { %v904_v9 = vmul.f32 %v3336_v52, %v820_v3  ;;  %v434_v52 = vld [vmem:[%s3788_s7] sm:$0xff] }
 0x4a7   : > { %v3015_v5 = vpop.eup %3014 }
 0x4a8   : > { %v822_v8 = vmul.f32 %v3015_v5, %v3011_v43 }
 0x4aa   : > { %v905_v28 = vmul.f32 %v3334_v50, %v822_v8  ;;  %v435_v50 = vld [vmem:[%s3788_s7 + $0x8] sm:$0xff] }
 0x4ab   : > { %v2881_v13 = vpack.c.bf16 %v435_v50, %v434_v52 }
 0x4ac   : > { %v2878_v11 = vpack.c.bf16 %v905_v28, %v904_v9 }
 0x4ae   : > { %2879 = vmatpush3.bf16.msra.mxu1 %v2878_v11 }
 0x4af   : > { %2880 = vmatprep.subr.bf16.mxu1 %v3132_v2 }
 0x4b1   : > { %2695 = vmatmul.mubr.msk.f32.vlgmr.msra.gmra.mrb[6].mxu1 %vm465_vm1, %v400_v12 }
 0x4b2   : > { %2713 = vmatprep.mubr.msk.f32.mxu1 %vm3133_vm0, %v3134_v4  ;;  %2882 = vmatpush3.bf16.msra.mxu1 %v2881_v13 }
 0x4b3   : > { %2883 = vmatprep.subr.bf16.mxu1 %v3132_v2 }
 0x4b6   : > { %2885 = vmatpush3.bf16.msra.mxu1 %v2884_v16 }
 0x4b7   : > { %2886 = vmatprep.subr.bf16.mxu1 %v3132_v2 }
 0x4ba   : > { %2888 = vmatpush3.bf16.msra.mxu1 %v2887_v19 }
 0x4bb   : > { %2889 = vmatprep.subr.bf16.mxu1 %v3132_v2 }
 0x4be   : > { %2891 = vmatpush3.bf16.msra.mxu1 %v2890_v22 }
 0x4bf   : > { %2898 = vmatprep.subr.bf16.mxu1 %v3132_v2 }
 0x584   : > { %v979_v24 = vpop.f32.mrb[6].mxu1 }
 0x585   : > { %v980_v25 = vadd.f32 %v2508_v23, %v979_v24  ;;  %v2696_v27 = vpop.f32.mrb[7].mxu1 }
 0x587   : > { %v984_v30 = vmul.f32 1.442695, %v980_v25  ;;  %vm983_vm12 = vcmp.gt.f32.partialorder %v980_v25, 0.0 }
 0x589   : > { %3016 = vpow2.f32 %v984_v30 }
 0x593   : > { %v3017_v32 = vpop.eup %3016 }
 0x594   : > { %v2510_v33 = vadd.f32 -1.0, %v3017_v32 }
 0x596   : > { %v987_v37 = vsel %vm983_vm12, %v980_v25, %v2510_v33 }
 0x597   : > { %v992_v38 = vsel %vm648_vm4, %v987_v37, %v990_v35 }
 0x598   : > { %2714 = vmatmul.mubr.msk.f32.vlgmr.msra.gmra.mrb[8].mxu1 %vm997_vm13, %v992_v38 }
 0x599   : > { %2739 = vmatprep.mubr.msk.f32.mxu1 %vm3133_vm0, %v3134_v4 }
 0x66b   : > { %v1067_v40 = vpop.f32.mrb[8].mxu1 }
 0x66c   : > { %v1068_v41 = vadd.f32 %v2511_v39, %v1067_v40  ;;  %v2715_v42 = vpop.f32.mrb[9].mxu1 }
 0x66e   : > { %1078 = vrot.lane.b32.xlu0 %v1068_v41, %s3135_s23  ;;  %v2513_v43 = vmul.f32 -1.442695, %v1068_v41 }
 0x670   : > { %3018 = vpow2.f32 %v2513_v43 }
 0x67a   : > { %v3019_v44 = vpop.eup %3018 }
 0x67b   : > { %v1074_v45 = vadd.f32 1.0, %v3019_v44 }
 0x67d   : > { %3020 = vrcp.f32 %v1074_v45 }
 0x687   : > { %v3021_v46 = vpop.eup %3020 }
 0x688   : > { %v1088_v61 = vsub.f32 1.0, %v3021_v46  ;;  %v1094_v63 = vmul.f32 %v3021_v46, %v990_v35 }
 0x6e0   : > { %v1079_v47 = vpop.permute.xlu0 %1078 }
 0x6e1   : > { %v1081_v48 = vmul.f32 %v3021_v46, %v1079_v47 }
 0x6e3   : > { %1083 = vrot.lane.b32.xlu1 %v1081_v48, %s3136_s12 }
 0x755   : > { %v1084_v51 = vpop.permute.xlu1 %1083 }
 0x756   : > { %v1086_v53 = vadd.f32 %v1084_v51, %v1068_v41 }
 0x758   : > { %3022 = vtanh.f32 %v1086_v53 }
 0x762   : > { %v3023_v60 = vpop.eup %3022 }
 0x763   : > { %1090 = vrot.lane.b32.xlu1 %v3023_v60, %s3137_s10 }
 0x7d5   : > { %v1091_v62 = vpop.permute.xlu1 %1090 }
 0x7d6   : > { %v1093_v0 = vmul.f32 %v1091_v62, %v1088_v61 }
 0x7d8   : > { %v1095_v1 = vadd.f32 %v1094_v63, %v1093_v0 }
 0x7da   : > { %v3435_v3 = vmax.f32 %v1095_v1, 0.0 }
 0x7dc   : > { %1098 = vrot.lane.b32.xlu1 %v3435_v3, %s3137_s10 }
 0x84e   : > { %v1099_v5 = vpop.permute.xlu1 %1098 }
 0x84f   : > { %2725 = vmatmul.mubr.msk.f32.vlgmr.msra.gmra.mrb[4].mxu0 %vm648_vm4, %v1099_v5 }
 0x850   : > { %2729 = vmatprep.mubr.msk.f32.mxu0 %vm542_vm2, %v2545_v7  ;;  %v3456_v7 = vld [vmem:[%s3787_s6 + $0x90] sm:$0x7] }
 0x851   : > { %v1260_v6 = vrot.slane %v3456_v7, %v3332_v49  ;;  %v1272_v52 = vrot.slane %v3456_v7, %v753_v36 }
 0x922   : > { %v1168_v8 = vpop.f32.mrb[4].mxu0 }
 0x923   : > { %v2726_v9 = vpop.f32.mrb[5].mxu0  ;;  %2727 = vmatprep.subr.mxu0 %v1168_v8 }
 0x924   : > { %2728 = vmatpush3.msra.mxu0 %v1168_v8 }
 0x925   : > { %2730 = vmatmul.mubr.msk.f32.vlgmr.msra.gmra.mrb[6].mxu0 %vm542_vm2, %v2546_v26  ;;  %2901 = vmatprep.subr.bf16.mxu0 %v3132_v2 }
 0x926   : > { %2732 = vmatprep.mubr.msk.f32.mxu0 %vm542_vm2, %v3297_v29 }
 0x929   : > { %2733 = vmatmul.mubr.msk.f32.gmra.mrb[8].mxu0 %vm542_vm2, %v3301_v31 }
 0x92a   : > { %2758 = vmatprep.mubr.msk.f32.mxu0 %vm3133_vm0, %v3134_v4 }
 0x9f8   : > { %v3460_v26 = vpop.f32.mrb[6].mxu0 }
 0x9f9   : > { %v1262_v28 = vmul.f32 %v3460_v26, %v1260_v6  ;;  %v3463_v11 = vpop.f32.mrb[7].mxu0 }
 0x9fa   : > { %v1261_v50 = vmul.f32 %v1260_v6, %v3463_v11 }
 0x9fb   : > { %v1266_v13 = vsel %vm648_vm4, %v1262_v28, 0.0 }
 0x9fc   : > { %1267 = vadd.xlane.f32.xlu0 %v1266_v13  ;;  %v2734_v14 = vpop.f32.mrb[8].mxu0  ;;  %v1263_v15 = vsel %vm648_vm4, %v1261_v50, 0.0 }
 0x9fd   : > { %v1274_v16 = vmul.f32 %v2734_v14, %v1272_v52  ;;  %1264 = vadd.xlane.f32.xlu1 %v1263_v15  ;;  %v1248_v17 = vpop.f32.mrb[9].mxu0 }
 0x9fe   : > { %v1273_v18 = vmul.f32 %v1272_v52, %v1248_v17 }
 0x9ff   : > { %v1278_v19 = vsel %vm648_vm4, %v1274_v16, 0.0 }
 0xa00   : > { %v1275_v20 = vsel %vm648_vm4, %v1273_v18, 0.0 }
 0xa01   : > { %1279 = vadd.xlane.f32.xlu1 %v1278_v19  ;;  %1276 = vadd.xlane.f32.xlu0 %v1275_v20 }
 0xa89   : > { %v1268_v21 = vpop.xlane.xlu0 %1267 }
 0xa8a   : > { %v1265_v36 = vpop.xlane.xlu1 %1264 }
 0xa8e   : > { %v1280_v22 = vpop.xlane.xlu1 %1279  ;;  %v1277_v23 = vpop.xlane.xlu0 %1276 }
 0xa8f   : > { %v1282_v24 = vadd.f32 %v1280_v22, %v1268_v21  ;;  %v1281_v25 = vadd.f32 %v1277_v23, %v1265_v36 }
 0xa91   : > { %vm1284_vm14 = vcmp.gt.f32.partialorder %v1282_v24, 0.0  ;;  %v1286_v27 = vmul.f32 0.01, %v1282_v24  ;;  %vm1283_vm15 = vcmp.gt.f32.partialorder %v1281_v25, 0.0  ;;  %v1285_v30 = vmul.f32 0.01, %v1281_v25 }
 0xa93   : > { %v1288_v32 = vsel %vm1284_vm14, %v1282_v24, %v1286_v27  ;;  %v1287_v33 = vsel %vm1283_vm15, %v1281_v25, %v1285_v30  ;;  %v443_v25 = vld [vmem:[%s3788_s7 + $0x48] sm:$0xff] }
 0xa94   : > { %v1290_v35 = vsel %vm772_vm10, %v1288_v32, -1e+30  ;;  %v1289_v37 = vsel %vm771_vm9, %v1287_v33, -1e+30  ;;  %v447_v30 = vld [vmem:[%s3788_s7 + $0x68] sm:$0xff] }
 0xa95   : > { %v1292_v38 = vsel %vm542_vm2, %v1290_v35, -inf  ;;  %v1291_v39 = vsel %vm542_vm2, %v1289_v37, -inf  ;;  %v449_v35 = vld [vmem:[%s3788_s7 + $0x78] sm:$0xff]  ;;  %v450_v37 = vld [vmem:[%s3788_s7 + $0x80] sm:$0xff] }
 0xa96   : > { %v1293_v40 = vmax.f32 %v1291_v39, %v1292_v38  ;;  %v2911_v38 = vpack.c.bf16 %v450_v37, %v449_v35  ;;  %v1343_v39 = vsub.s32 2, %v3314_v34  ;;  %v2521_v34 = vld [vmem:[%s3788_s7 + $0x88] ss:$0 sm:$0xff] }
 0xa98   : > { %v1294_v41 = vrot.slane %v1293_v40, 4 }
 0xa9a   : > { %v1295_v42 = vmax.f32 %v1293_v40, %v1294_v41  ;;  %v1344_v40 = vrot.slane %v3456_v7, %v1343_v39 }
 0xa9c   : > { %v1296_v43 = vrot.slane %v1295_v42, 2 }
 0xa9e   : > { %v1297_v44 = vmax.f32 %v1295_v42, %v1296_v43 }
 0xaa0   : > { %v1298_v45 = vrot.slane %v1297_v44, 1 }
 0xaa2   : > { %v1299_v46 = vmax.f32 %v1297_v44, %v1298_v45 }
 0xaa4   : > { %v1301_v47 = vmul.f32 %v3301_v31, %v1299_v46  ;;  %v1300_v48 = vmul.f32 %v3297_v29, %v1299_v46 }
 0xaa6   : > { %v1305_v51 = vsel %vm542_vm2, %v1301_v47, 0.0  ;;  %v1302_v53 = vsel %vm542_vm2, %v1300_v48, 0.0 }
 0xaa7   : > { %1306 = vadd.xlane.f32.xlu1 %v1305_v51  ;;  %1303 = vadd.xlane.f32.xlu0 %v1302_v53 }
 0xb34   : > { %v1307_v54 = vpop.xlane.xlu1 %1306  ;;  %v1304_v55 = vpop.xlane.xlu0 %1303 }
 0xb35   : > { %v1309_v56 = vsub.f32 %v1288_v32, %v1307_v54  ;;  %v1308_v57 = vsub.f32 %v1287_v33, %v1304_v55  ;;  %v448_v32 = vld [vmem:[%s3788_s7 + $0x70] sm:$0xff] }
 0xb36   : > { %v2908_v33 = vpack.c.bf16 %v448_v32, %v447_v30 }
 0xb37   : > { %v1312_v58 = vmul.f32 1.442695, %v1309_v56  ;;  %v1310_v59 = vmul.f32 1.442695, %v1308_v57 }
 0xb39   : > { %3024 = vpow2.f32 %v1312_v58 }
 0xb3a   : > { %3026 = vpow2.f32 %v1310_v59 }
 0xb43   : > { %v3025_v60 = vpop.eup %3024 }
 0xb44   : > { %v3027_v61 = vpop.eup %3026  ;;  %v1315_v62 = vmul.f32 %v3025_v60, %v3301_v31 }
 0xb45   : > { %v1314_v63 = vmul.f32 %v3027_v61, %v3297_v29 }
 0xb46   : > { %v1317_v0 = vsel %vm542_vm2, %v1315_v62, 0.0 }
 0xb47   : > { %v1316_v1 = vsel %vm542_vm2, %v1314_v63, 0.0  ;;  %v424_v63 = vld [vmem:[%s3787_s6 + $0x98] sm:$0xff] }
 0xb48   : > { %v1318_v5 = vadd.f32 %v1317_v0, %v1316_v1  ;;  %v425_v0 = vld [vmem:[%s3787_s6 + $0xa0] sm:$0xff] }
 0xb49   : > { %v2914_v1 = vpack.c.bf16 %v425_v0, %v424_v63 }
 0xb4a   : > { %v1319_v8 = vrot.slane %v1318_v5, 4 }
 0xb4c   : > { %v1320_v9 = vadd.f32 %v1319_v8, %v1318_v5  ;;  %v426_v5 = vld [vmem:[%s3787_s6 + $0xa8] sm:$0xff]  ;;  %v427_v8 = vld [vmem:[%s3787_s6 + $0xb0] sm:$0xff] }
 0xb4e   : > { %v1321_v6 = vrot.slane %v1320_v9, 2 }
 0xb50   : > { %v1322_v28 = vadd.f32 %v1321_v6, %v1320_v9  ;;  %v2917_v9 = vpack.c.bf16 %v427_v8, %v426_v5  ;;  %v452_v5 = vld [vmem:[%s3788_s7 + $0x90] sm:$0xff]  ;;  %v453_v8 = vld [vmem:[%s3788_s7 + $0x98] sm:$0xff] }
 0xb52   : > { %v1323_v52 = vrot.slane %v1322_v28, 1 }
 0xb54   : > { %v1324_v50 = vadd.f32 %v1323_v52, %v1322_v28 }
 0xb56   : > { %v1326_v13 = vmul.f32 %v3301_v31, %v1324_v50  ;;  %v1325_v14 = vmul.f32 %v3297_v29, %v1324_v50 }
 0xb58   : > { %v1330_v15 = vsel %vm542_vm2, %v1326_v13, 0.0  ;;  %v1327_v16 = vsel %vm542_vm2, %v1325_v14, 0.0 }
 0xb59   : > { %1331 = vadd.xlane.f32.xlu1 %v1330_v15  ;;  %1328 = vadd.xlane.f32.xlu0 %v1327_v16  ;;  %v401_v15 = vld [vmem:[%s383_s24] sm:$0x1]  ;;  %s3074_s24 = scalar_lea.vmem %s3073_s20, 32 }
 0xb5a   : > { %v3560_v16 = vunpack.c.l.bf16 %v401_v15  ;;  %v458_v15 = vld [vmem:[%s3788_s7 + $0xc0] sm:$0xff] }
 0xbe6   : > { %v1332_v17 = vpop.xlane.xlu1 %1331  ;;  %v1329_v18 = vpop.xlane.xlu0 %1328 }
 0xbe7   : > { %v1334_v19 = vadd.f32 1e-16, %v1332_v17  ;;  %v1333_v20 = vadd.f32 1e-16, %v1329_v18 }
 0xbe9   : > { %3028 = vrcp.f32 %v1334_v19 }
 0xbea   : > { %3030 = vrcp.f32 %v1333_v20  ;;  %v3575_v20 = vld [vmem:[%s3787_s6 + $0xb8] sm:$0x7] }
 0xbf3   : > { %v3029_v21 = vpop.eup %3028 }
 0xbf4   : > { %v3031_v36 = vpop.eup %3030  ;;  %v1338_v22 = vmul.f32 %v3029_v21, %v3025_v60  ;;  %v1677_v21 = vrot.slane %v3575_v20, %v3332_v49 }
 0xbf5   : > { %v1336_v23 = vmul.f32 %v3031_v36, %v3027_v61 }
 0xbf6   : > { %v1340_v31 = vmul.f32 %v3460_v26, %v1338_v22  ;;  %v444_v26 = vld [vmem:[%s3788_s7 + $0x50] sm:$0xff] }
 0xbf7   : > { %v1339_v29 = vmul.f32 %v1336_v23, %v3463_v11  ;;  %v2902_v11 = vpack.c.bf16 %v444_v26, %v443_v25 }
 0xbf9   : > { %v2899_v24 = vpack.c.bf16 %v1340_v31, %v1339_v29  ;;  %2903 = vmatpush3.bf16.msra.mxu0 %v2902_v11  ;;  %v1756_v29 = vrot.slane %v3575_v20, 1 }
 0xbfa   : > { %2904 = vmatprep.subr.bf16.mxu0 %v3132_v2 }
 0xbfb   : > { %2900 = vmatpush3.bf16.msra.mxu1 %v2899_v24 }
 0xbfc   : > { %2761 = vmatprep.subr.mxu1 %v3134_v4 }
 0xbfe   : > { %2740 = vmatmul.mubr.msk.f32.vlgmr.msra.gmra.mrb[10].mxu1 %vm465_vm1, %v400_v12  ;;  %v446_v12 = vld [vmem:[%s3788_s7 + $0x60] sm:$0xff] }
 0xbff   : > { %2763 = vmatprep.mubr.msk.f32.mxu1 %vm3133_vm0, %v3134_v4  ;;  %v2905_v27 = vpack.c.bf16 %v446_v12, %v445_v10  ;;  %v3138_v10 = vmov 0   ;;  %v403_v12 = vld [vmem:[%s387_s18] sm:$0xf] }
 0xc00   : > { %3007 = vset.pattern.permute.xlu0 %v3138_v10  ;;  %v3598_v30 = vunpack.c.l.bf16 %v403_v12  ;;  %v3668_v10 = vld [vmem:[%s3788_s7 + $0xd0] sm:$0x1] }
 0xc01   : > { %2906 = vmatpush3.bf16.msra.mxu0 %v2905_v27 }
 0xc02   : > { %2907 = vmatprep.subr.bf16.mxu0 %v3132_v2  ;;  %vm1771_vm5 = vcmp.gt.f32.partialorder %v3598_v30, 0.5 }
 0xc05   : > { %2909 = vmatpush3.bf16.msra.mxu0 %v2908_v33 }
 0xc06   : > { %2910 = vmatprep.subr.bf16.mxu0 %v3132_v2 }
 0xc09   : > { %2912 = vmatpush3.bf16.msra.mxu0 %v2911_v38 }
 0xc0a   : > { %2919 = vmatprep.subr.bf16.mxu0 %v3132_v2 }
 0xcd1   : > { %v1411_v41 = vpop.f32.mrb[10].mxu1 }
 0xcd2   : > { %v1412_v42 = vadd.f32 %v1411_v41, %v1344_v40  ;;  %v2741_v43 = vpop.f32.mrb[11].mxu1 }
 0xcd4   : > { %v1416_v44 = vmul.f32 1.442695, %v1412_v42  ;;  %vm1415_vm1 = vcmp.gt.f32.partialorder %v1412_v42, 0.0 }
 0xcd6   : > { %3032 = vpow2.f32 %v1416_v44 }
 0xce0   : > { %v3033_v45 = vpop.eup %3032 }
 0xce1   : > { %v2520_v46 = vadd.f32 -1.0, %v3033_v45 }
 0xce3   : > { %v1419_v47 = vsel %vm1415_vm1, %v1412_v42, %v2520_v46 }
 0xce4   : > { %v1420_v48 = vsel %vm648_vm4, %v1419_v47, %v3435_v3 }
 0xce5   : > { %2759 = vmatmul.mubr.msk.f32.vlgmr.msra.gmra.mrb[10].mxu0 %vm997_vm13, %v1420_v48 }
 0xce6   : > { %2785 = vmatprep.mubr.msk.f32.mxu0 %vm3133_vm0, %v3134_v4  ;;  %2921 = vmatpush3.bf16.msra.mxu0 %v2914_v1 }
 0xce7   : > { %2922 = vmatprep.subr.bf16.mxu0 %v3132_v2 }
 0xcea   : > { %2924 = vmatpush3.bf16.msra.mxu0 %v2917_v9 }
 0xceb   : > { %2937 = vmatprep.subr.bf16.mxu0 %v3132_v2 }
 0xdb8   : > { %v1494_v7 = vpop.f32.mrb[10].mxu0 }
 0xdb9   : > { %v1495_v51 = vadd.f32 %v2521_v34, %v1494_v7  ;;  %v2760_v53 = vpop.f32.mrb[11].mxu0 }
 0xdbb   : > { %1505 = vrot.lane.b32.xlu0 %v1495_v51, %s3135_s23  ;;  %v2523_v54 = vmul.f32 -1.442695, %v1495_v51 }
 0xdbd   : > { %3034 = vpow2.f32 %v2523_v54 }
 0xdc7   : > { %v3035_v55 = vpop.eup %3034 }
 0xdc8   : > { %v1501_v56 = vadd.f32 1.0, %v3035_v55 }
 0xdca   : > { %3036 = vrcp.f32 %v1501_v56 }
 0xdd4   : > { %v3037_v57 = vpop.eup %3036 }
 0xdd5   : > { %v1515_v6 = vsub.f32 1.0, %v3037_v57  ;;  %v1521_v52 = vmul.f32 %v3037_v57, %v3435_v3 }
 0xe2d   : > { %v1506_v58 = vpop.permute.xlu0 %1505 }
 0xe2e   : > { %v1508_v59 = vmul.f32 %v3037_v57, %v1506_v58 }
 0xe30   : > { %1510 = vrot.lane.b32.xlu1 %v1508_v59, %s3136_s12 }
 0xea2   : > { %v1511_v60 = vpop.permute.xlu1 %1510 }
 0xea3   : > { %v1513_v61 = vadd.f32 %v1511_v60, %v1495_v51 }
 0xea5   : > { %3038 = vtanh.f32 %v1513_v61 }
 0xeaf   : > { %v3039_v62 = vpop.eup %3038 }
 0xeb0   : > { %1517 = vrot.lane.b32.xlu1 %v3039_v62, %s3137_s10 }
 0xf22   : > { %v1518_v28 = vpop.permute.xlu1 %1517 }
 0xf23   : > { %v1520_v50 = vmul.f32 %v1518_v28, %v1515_v6  ;;  %v454_v6 = vld [vmem:[%s3788_s7 + $0xa0] sm:$0xff]  ;;  %v455_v28 = vld [vmem:[%s3788_s7 + $0xa8] sm:$0xff] }
 0xf25   : > { %v1522_v13 = vadd.f32 %v1521_v52, %v1520_v50  ;;  %v3634_v52 = vpack.c.bf16 %v455_v28, %v454_v6  ;;  %v456_v50 = vld [vmem:[%s3788_s7 + $0xb0] sm:$0xff] }
 0xf27   : > { %v1523_v14 = vmax.f32 %v1522_v13, 0.0  ;;  %v457_v13 = vld [vmem:[%s3788_s7 + $0xb8] sm:$0xff] }
 0xf29   : > { %1525 = vrot.lane.b32.xlu0 %v1523_v14, %s3137_s10  ;;  %v3644_v14 = vpack.c.bf16 %v457_v13, %v456_v50 }
 0xf9b   : > { %v1526_v17 = vpop.permute.xlu0 %1525 }
 0xf9c   : > { %2762 = vmatpush3.msra.mxu1 %v1526_v17 }
 0xf9d   : > { %2764 = vmatmul.mubr.msk.f32.vlgmr.msra.gmra.mrb[12].mxu1 %vm542_vm2, %v3560_v16  ;;  %2913 = vmatprep.subr.bf16.mxu1 %v3132_v2 }
 0xf9e   : > { %2915 = vmatpush3.bf16.msra.mxu1 %v2914_v1  ;;  %2774 = vmatprep.mubr.msk.f32.mxu1 %vm3133_vm0, %v3134_v4 }
 0xf9f   : > { %2916 = vmatprep.subr.bf16.mxu1 %v3132_v2 }
 0xfa2   : > { %2918 = vmatpush3.bf16.msra.mxu1 %v2917_v9 }
 0xfa3   : > { %2788 = vmatprep.subr.mxu1 %v3134_v4 }
 0xfa5   : > { %2775 = vmatmul.mubr.msk.f32.vlgmr.msra.gmra.mrb[14].mxu1 %vm648_vm4, %v1526_v17  ;;  %v459_v17 = vld [vmem:[%s3788_s7 + $0xc8] sm:$0xff] }
 0xfa6   : > { %2790 = vmatprep.mubr.msk.f32.mxu1 %vm3133_vm0, %v3134_v4 }
0x1070   : > { %v1597_v3 = vpop.f32.mrb[12].mxu1 }
0x1071   : > { %v1601_v18 = vmax.f32 %v1597_v3, 0.0  ;;  %v2765_v19 = vpop.f32.mrb[13].mxu1  ;;  %v3654_v3 = vpack.c.bf16 %v459_v17, %v458_v15 }
0x1073   : > { %2786 = vmatmul.mubr.msk.f32.vlgmr.msra.gmra.mrb[12].mxu0 %vm648_vm4, %v1601_v18 }
0x1074   : > { %2939 = vmatpush3.bf16.msra.mxu0 %v2914_v1  ;;  %2820 = vmatprep.mubr.msk.f32.mxu0 %vm3133_vm0, %v3134_v4 }
0x1075   : > { %2940 = vmatprep.subr.bf16.mxu0 %v3132_v2 }
0x1078   : > { %v3583_v36 = vpop.f32.mrb[14].mxu1  ;;  %2942 = vmatpush3.bf16.msra.mxu0 %v2917_v9  ;;  %v3624_v9 = vpack.c.bf16 %v453_v8, %v452_v5 }
0x1079   : > { %v2776_v22 = vpop.f32.mrb[15].mxu1  ;;  %v1678_v23 = vmul.f32 %v1677_v21, %v3583_v36  ;;  %2823 = vmatprep.subr.mxu0 %v3134_v4 }
0x107b   : > { %v1679_v31 = vsel %vm648_vm4, %v1678_v23, 0.0 }
0x107c   : > { %1680 = vadd.xlane.f32.xlu0 %v1679_v31 }
0x1109   : > { %v3601_v33 = vpop.xlane.xlu0 %1680 }
0x1146   : > { %v1751_v24 = vpop.f32.mrb[12].mxu0 }
0x1147   : > { %v1758_v25 = vmul.f32 %v1756_v29, %v1751_v24  ;;  %v2787_v26 = vpop.f32.mrb[13].mxu0 }
0x1149   : > { %v1760_v11 = vsel %vm1759_vm3, %v1758_v25, 0.0 }
0x114a   : > { %1761 = vadd.xlane.f32.xlu1 %v1760_v11 }
0x115b   : > { %1882 = vrot.lane.b32.xlu1 %v1601_v18, %s3135_s23  ;;  %v1805_v18 = vrot.slane %v3575_v20, 2 }
0x11d7   : > { %v1762_v27 = vpop.xlane.xlu1 %1761 }
0x11d8   : > { %v1766_v32 = vrot.slane %v1762_v27, %v3332_v49 }
0x11da   : > { %v1767_v35 = vadd.f32 %v1766_v32, %v3601_v33 }
0x11db   : > { %v1883_v25 = vpop.permute.xlu1 %1882 }
0x11dc   : > { %vm1768_vm6 = vcmp.gt.f32.partialorder %v1767_v35, 0.0  ;;  %v1769_v37 = vmul.f32 0.01, %v1767_v35 }
0x11de   : > { %v1770_v38 = vsel %vm1768_vm6, %v1767_v35, %v1769_v37 }
0x11df   : > { %v1772_v39 = vsel %vm1771_vm5, %v1770_v38, -1e+30 }
0x11e0   : > { %v1774_v40 = vsel %vm1773_vm7, %v1772_v39, -inf }
0x11e1   : > { %v1775_v41 = vrot.slane %v1774_v40, 4 }
0x11e3   : > { %v1776_v42 = vmax.f32 %v1774_v40, %v1775_v41 }
0x11e5   : > { %v1777_v43 = vrot.slane %v1776_v42, 2 }
0x11e7   : > { %v1778_v44 = vmax.f32 %v1776_v42, %v1777_v43 }
0x11e9   : > { %v1779_v45 = vrot.slane %v1778_v44, 1 }
0x11eb   : > { %v1780_v46 = vmax.f32 %v1778_v44, %v1779_v45 }
0x11ed   : > { %v1781_v47 = vmul.f32 %v1780_v46, %v3598_v30 }
0x11ef   : > { %v1783_v48 = vsub.f32 %v1770_v38, %v1781_v47 }
0x11f1   : > { %v1784_v34 = vmul.f32 1.442695, %v1783_v48 }
0x11f3   : > { %3040 = vpow2.f32 %v1784_v34 }
0x11fd   : > { %v3041_v7 = vpop.eup %3040 }
0x11fe   : > { %v1786_v51 = vmul.f32 %v3041_v7, %v3598_v30 }
0x1200   : > { %v1787_v53 = vsel %vm1773_vm7, %v1786_v51, 0.0 }
0x1201   : > { %v1788_v54 = vrot.slane %v1787_v53, 4 }
0x1203   : > { %v1789_v55 = vadd.f32 %v1788_v54, %v1787_v53 }
0x1205   : > { %v1790_v56 = vrot.slane %v1789_v55, 2 }
0x1207   : > { %v1791_v57 = vadd.f32 %v1790_v56, %v1789_v55 }
0x1209   : > { %v1792_v58 = vrot.slane %v1791_v57, 1 }
0x120b   : > { %v1793_v59 = vadd.f32 %v1792_v58, %v1791_v57 }
0x120d   : > { %v1794_v60 = vmul.f32 %v1793_v59, %v3598_v30 }
0x120f   : > { %v1796_v61 = vadd.f32 1e-16, %v1794_v60 }
0x1211   : > { %3042 = vrcp.f32 %v1796_v61 }
0x121b   : > { %v3043_v62 = vpop.eup %3042 }
0x121c   : > { %v1798_v63 = vmul.f32 %v3043_v62, %v3041_v7 }
0x121e   : > { %1801 = vperm.xlu0 %3007, %v1798_v63  }
0x129d   : > { %v1802_v0 = vpop.permute.xlu0 %1801 }
0x129e   : > { %v1804_v1 = vmul.f32 %v1802_v0, %v3583_v36 }
0x12a0   : > { %2789 = vmatpush3.msra.mxu1 %v1804_v1 }
0x12a1   : > { %2791 = vmatmul.mubr.msk.f32.vlgmr.msra.gmra.mrb[16].mxu1 %vm542_vm2, %v3560_v16  ;;  %2925 = vmatprep.subr.bf16.mxu1 %v3132_v2 }
0x12a2   : > { %2809 = vmatprep.mubr.msk.f32.mxu1 %vm3133_vm0, %v3134_v4  ;;  %2927 = vmatpush3.bf16.msra.mxu1 %v3624_v9 }
0x12a3   : > { %2928 = vmatprep.subr.bf16.mxu1 %v3132_v2 }
0x12a6   : > { %2930 = vmatpush3.bf16.msra.mxu1 %v3634_v52 }
0x12a7   : > { %2931 = vmatprep.subr.bf16.mxu1 %v3132_v2 }
0x12aa   : > { %2933 = vmatpush3.bf16.msra.mxu1 %v3644_v14 }
0x12ab   : > { %2934 = vmatprep.subr.bf16.mxu1 %v3132_v2 }
0x12ae   : > { %2936 = vmatpush3.bf16.msra.mxu1 %v3654_v3 }
0x12af   : > { %2955 = vmatprep.subr.bf16.mxu1 %v3132_v2 }
0x1374   : > { %v1873_v19 = vpop.f32.mrb[16].mxu1 }
0x1375   : > { %v1874_v21 = vadd.f32 %v1873_v19, %v1805_v18  ;;  %v2792_v22 = vpop.f32.mrb[17].mxu1 }
0x1377   : > { %v1878_v23 = vmul.f32 1.442695, %v1874_v21  ;;  %vm1877_vm8 = vcmp.gt.f32.partialorder %v1874_v21, 0.0 }
0x1379   : > { %3044 = vpow2.f32 %v1878_v23 }
0x1383   : > { %v3045_v31 = vpop.eup %3044 }
0x1384   : > { %v2528_v24 = vadd.f32 -1.0, %v3045_v31 }
0x1386   : > { %v1881_v26 = vsel %vm1877_vm8, %v1874_v21, %v2528_v24 }
0x1387   : > { %v1885_v11 = vsel %vm648_vm4, %v1881_v26, %v1883_v25 }
0x1388   : > { %2810 = vmatmul.mubr.msk.f32.vlgmr.msra.gmra.mrb[18].mxu1 %vm997_vm13, %v1885_v11 }
0x1389   : > { %2855 = vmatprep.mubr.msk.f32.mxu1 %vm3133_vm0, %v3134_v4 }
0x145b   : > { %v1955_v12 = vpop.f32.mrb[18].mxu1 }
0x145c   : > { %v1956_v27 = vadd.f32 %v1955_v12, %v3668_v10  ;;  %v2811_v32 = vpop.f32.mrb[19].mxu1 }
0x145e   : > { %1966 = vrot.lane.b32.xlu1 %v1956_v27, %s3135_s23  ;;  %v2530_v35 = vmul.f32 -1.442695, %v1956_v27 }
0x1460   : > { %3046 = vpow2.f32 %v2530_v35 }
0x146a   : > { %v3047_v37 = vpop.eup %3046 }
0x146b   : > { %v1962_v38 = vadd.f32 1.0, %v3047_v37 }
0x146d   : > { %3048 = vrcp.f32 %v1962_v38 }
0x1477   : > { %v3049_v39 = vpop.eup %3048 }
0x1478   : > { %v1976_v45 = vsub.f32 1.0, %v3049_v39  ;;  %v1982_v47 = vmul.f32 %v3049_v39, %v1883_v25 }
0x14d0   : > { %v1967_v40 = vpop.permute.xlu1 %1966 }
0x14d1   : > { %v1969_v41 = vmul.f32 %v3049_v39, %v1967_v40 }
0x14d3   : > { %1971 = vrot.lane.b32.xlu1 %v1969_v41, %s3136_s12 }
0x1545   : > { %v1972_v42 = vpop.permute.xlu1 %1971 }
0x1546   : > { %v1974_v43 = vadd.f32 %v1972_v42, %v1956_v27 }
0x1548   : > { %3050 = vtanh.f32 %v1974_v43 }
0x1552   : > { %v3051_v44 = vpop.eup %3050 }
0x1553   : > { %1978 = vrot.lane.b32.xlu1 %v3051_v44, %s3137_s10  ;;  %v430_v44 = vld [vmem:[%s3787_s6 + $0xc8] sm:$0xff] }
0x15c5   : > { %v1979_v46 = vpop.permute.xlu1 %1978 }
0x15c6   : > { %v1981_v48 = vmul.f32 %v1979_v46, %v1976_v45  ;;  %v431_v45 = vld [vmem:[%s3787_s6 + $0xd0] sm:$0xff] }
0x15c8   : > { %v1983_v34 = vadd.f32 %v1982_v47, %v1981_v48  ;;  %v432_v47 = vld [vmem:[%s3787_s6 + $0xd8] sm:$0xff] }
0x15c9   : > { %v2959_v48 = vpack.c.bf16 %v432_v47, %v431_v45 }
0x15ca   : > { %v3674_v7 = vmax.f32 %v1983_v34, 0.0 }
0x15cc   : > { %1986 = vrot.lane.b32.xlu1 %v3674_v7, %s3137_s10 }
0x163e   : > { %v1987_v51 = vpop.permute.xlu1 %1986 }
0x163f   : > { %2821 = vmatmul.mubr.msk.f32.vlgmr.msra.gmra.mrb[14].mxu0 %vm648_vm4, %v1987_v51 }
0x1640   : > { %2825 = vmatprep.mubr.msk.f32.mxu0 %vm3133_vm0, %v3134_v4 }
0x1712   : > { %v2056_v53 = vpop.f32.mrb[14].mxu0 }
0x1713   : > { %v2060_v54 = vmul.f32 %v2056_v53, %v1756_v29  ;;  %v2822_v55 = vpop.f32.mrb[15].mxu0 }
0x1715   : > { %v2061_v56 = vsel %vm1759_vm3, %v2060_v54, 0.0 }
0x1716   : > { %2062 = vadd.xlane.f32.xlu1 %v2061_v56 }
0x17a3   : > { %v2063_v57 = vpop.xlane.xlu1 %2062 }
0x17a4   : > { %v2067_v58 = vrot.slane %v2063_v57, %v3332_v49 }
0x17a6   : > { %v2068_v59 = vadd.f32 %v2067_v58, %v3601_v33 }
0x17a8   : > { %vm2069_vm9 = vcmp.gt.f32.partialorder %v2068_v59, 0.0  ;;  %v2070_v60 = vmul.f32 0.01, %v2068_v59 }
0x17aa   : > { %v2071_v61 = vsel %vm2069_vm9, %v2068_v59, %v2070_v60 }
0x17ab   : > { %v2072_v62 = vsel %vm1771_vm5, %v2071_v61, -1e+30 }
0x17ac   : > { %v2073_v63 = vsel %vm1773_vm7, %v2072_v62, -inf }
0x17ad   : > { %v2074_v0 = vrot.slane %v2073_v63, 4 }
0x17af   : > { %v2075_v1 = vmax.f32 %v2073_v63, %v2074_v0 }
0x17b1   : > { %v2076_v29 = vrot.slane %v2075_v1, 2 }
0x17b3   : > { %v2077_v5 = vmax.f32 %v2075_v1, %v2076_v29 }
0x17b5   : > { %v2078_v8 = vrot.slane %v2077_v5, 1 }
0x17b7   : > { %v2079_v6 = vmax.f32 %v2077_v5, %v2078_v8 }
0x17b9   : > { %v2080_v28 = vmul.f32 %v2079_v6, %v3598_v30 }
0x17bb   : > { %v2082_v50 = vsub.f32 %v2071_v61, %v2080_v28 }
0x17bd   : > { %v2083_v49 = vmul.f32 1.442695, %v2082_v50 }
0x17bf   : > { %3052 = vpow2.f32 %v2083_v49 }
0x17c9   : > { %v3053_v33 = vpop.eup %3052 }
0x17ca   : > { %v2085_v13 = vmul.f32 %v3053_v33, %v3598_v30 }
0x17cc   : > { %v2086_v15 = vsel %vm1773_vm7, %v2085_v13, 0.0 }
0x17cd   : > { %v2087_v17 = vrot.slane %v2086_v15, 4 }
0x17cf   : > { %v2088_v19 = vadd.f32 %v2087_v17, %v2086_v15 }
0x17d1   : > { %v2089_v21 = vrot.slane %v2088_v19, 2 }
0x17d3   : > { %v2090_v22 = vadd.f32 %v2089_v21, %v2088_v19 }
0x17d5   : > { %v2091_v23 = vrot.slane %v2090_v22, 1 }
0x17d7   : > { %v2092_v31 = vadd.f32 %v2091_v23, %v2090_v22 }
0x17d9   : > { %v2093_v24 = vmul.f32 %v2092_v31, %v3598_v30 }
0x17db   : > { %v2095_v25 = vadd.f32 1e-16, %v2093_v24 }
0x17dd   : > { %3054 = vrcp.f32 %v2095_v25 }
0x17e7   : > { %v3055_v26 = vpop.eup %3054 }
0x17e8   : > { %v2097_v11 = vmul.f32 %v3055_v26, %v3053_v33 }
0x17ea   : > { %2100 = vperm.xlu0 %3007, %v2097_v11  }
0x1869   : > { %v2101_v12 = vpop.permute.xlu0 %2100 }
0x186a   : > { %v2103_v27 = vmul.f32 %v2101_v12, %v3583_v36 }
0x186c   : > { %2824 = vmatpush3.msra.mxu0 %v2103_v27 }
0x186d   : > { %2826 = vmatmul.mubr.msk.f32.vlgmr.msra.gmra.mrb[16].mxu0 %vm542_vm2, %v3560_v16  ;;  %2943 = vmatprep.subr.bf16.mxu0 %v3132_v2  ;;  %vm2360_vm2 = vcmask 24576  }
0x186e   : > { %2945 = vmatpush3.bf16.msra.mxu0 %v3624_v9  ;;  %2844 = vmatprep.mubr.msk.f32.mxu0 %vm3133_vm0, %v3134_v4 }
0x186f   : > { %2946 = vmatprep.subr.bf16.mxu0 %v3132_v2 }
0x1872   : > { %2948 = vmatpush3.bf16.msra.mxu0 %v3634_v52 }
0x1873   : > { %2949 = vmatprep.subr.bf16.mxu0 %v3132_v2 }
0x1876   : > { %2951 = vmatpush3.bf16.msra.mxu0 %v3644_v14 }
0x1877   : > { %2952 = vmatprep.subr.bf16.mxu0 %v3132_v2 }
0x187a   : > { %2954 = vmatpush3.bf16.msra.mxu0 %v3654_v3 }
0x1940   : > { %v2170_v16 = vpop.f32.mrb[16].mxu0 }
0x1941   : > { %v2171_v36 = vadd.f32 %v2170_v16, %v1805_v18  ;;  %v2827_v30 = vpop.f32.mrb[17].mxu0 }
0x1943   : > { %v2175_v9 = vmul.f32 1.442695, %v2171_v36  ;;  %vm2174_vm0 = vcmp.gt.f32.partialorder %v2171_v36, 0.0 }
0x1945   : > { %3056 = vpow2.f32 %v2175_v9 }
0x194f   : > { %v3057_v4 = vpop.eup %3056 }
0x1950   : > { %v2533_v32 = vadd.f32 -1.0, %v3057_v4 }
0x1952   : > { %v2178_v35 = vsel %vm2174_vm0, %v2171_v36, %v2533_v32 }
0x1953   : > { %v2179_v52 = vsel %vm648_vm4, %v2178_v35, %v3674_v7 }
0x1954   : > { %2845 = vmatmul.mubr.msk.f32.vlgmr.msra.gmra.mrb[18].mxu0 %vm997_vm13, %v2179_v52 }
0x1a27   : > { %v2249_v14 = vpop.f32.mrb[18].mxu0 }
0x1a28   : > { %v2250_v37 = vadd.f32 %v2249_v14, %v3668_v10  ;;  %v2846_v3 = vpop.f32.mrb[19].mxu0  ;;  %v429_v10 = vld [vmem:[%s3787_s6 + $0xc0] sm:$0xff] }
0x1a29   : > { %v2956_v46 = vpack.c.bf16 %v430_v44, %v429_v10 }
0x1a2a   : > { %2260 = vrot.lane.b32.xlu0 %v2250_v37, %s3135_s23  ;;  %v2535_v20 = vmul.f32 -1.442695, %v2250_v37  ;;  %s2363_s23 = scalar_lea.sflag [#allocation3], %s361_s26 }
0x1a2b   : > { %2957 = vmatpush3.bf16.msra.mxu1 %v2956_v46 }
0x1a2c   : > { %3058 = vpow2.f32 %v2535_v20  ;;  %2958 = vmatprep.subr.bf16.mxu1 %v3132_v2  ;;  %v433_v2 = vld [vmem:[%s3787_s6 + $0xe0] sm:$0x1] }
0x1a2f   : > { %2960 = vmatpush3.bf16.msra.mxu1 %v2959_v48 }
0x1a36   : > { %v3059_v18 = vpop.eup %3058 }
0x1a37   : > { %v2256_v38 = vadd.f32 1.0, %v3059_v18 }
0x1a39   : > { %3060 = vrcp.f32 %v2256_v38 }
0x1a43   : > { %v3061_v39 = vpop.eup %3060 }
0x1a44   : > { %v2270_v51 = vsub.f32 1.0, %v3061_v39  ;;  %v2276_v54 = vmul.f32 %v3061_v39, %v3674_v7 }
0x1a9c   : > { %v2261_v40 = vpop.permute.xlu0 %2260 }
0x1a9d   : > { %v2263_v41 = vmul.f32 %v3061_v39, %v2261_v40 }
0x1a9f   : > { %2265 = vrot.lane.b32.xlu0 %v2263_v41, %s3136_s12 }
0x1b11   : > { %v2266_v42 = vpop.permute.xlu0 %2265 }
0x1b12   : > { %v2268_v43 = vadd.f32 %v2266_v42, %v2250_v37 }
0x1b14   : > { %3062 = vtanh.f32 %v2268_v43 }
0x1b1e   : > { %v3063_v34 = vpop.eup %3062 }
0x1b1f   : > { %2272 = vrot.lane.b32.xlu0 %v3063_v34, %s3137_s10 }
0x1b91   : > { %v2273_v53 = vpop.permute.xlu0 %2272 }
0x1b92   : > { %v2275_v55 = vmul.f32 %v2273_v53, %v2270_v51 }
0x1b94   : > { %v2277_v56 = vadd.f32 %v2276_v54, %v2275_v55 }
0x1b96   : > { %v2278_v57 = vmax.f32 %v2277_v56, 0.0 }
0x1b98   : > { %2280 = vrot.lane.b32.xlu0 %v2278_v57, %s3137_s10  ;;  %s2375_s10 = sshll.u32 %s362_s13, 4  ;;  %s3741_s10 = int_to_ptr.vmem [resolvable:$true] %s2375_s10 }
0x1b99   : > { %s3068_s19 = scalar_lea.vmem %s3741_s10, 16  ;;  %p3075_p0 = scmp.lt.s32.totalorder %s3741_s10, %s3073_s20 }
0x1b9a   : > { %p3069_p11 = scmp.ne.s32.totalorder %s3741_s10, %s3068_s19  ;;  %p3076_p1 = scmp.lt.s32.totalorder %s3074_s24, %s3068_s19 }
0x1b9c   : > { %p3070_p12 = pnand %p3069_p11, %p3223_p5  ;;  %p3077_p2 = por %p3076_p1, %p3075_p0 }
0x1b9e   : > { %p3071_p13 = pneg %p3070_p12 }
0x1ba0   : > { %p3078_p3 = pnand %p3077_p2, %p3071_p13 }
0x1c0a   : > { %v2281_v58 = vpop.permute.xlu0 %2280 }
0x1c0b   : > { %2856 = vmatmul.mubr.msk.f32.vlgmr.msra.gmra.mrb[20].mxu1 %vm648_vm4, %v2281_v58 }
0x1cde   : > { %v2350_v59 = vpop.f32.mrb[20].mxu1 }
0x1cdf   : > { %v2351_v60 = vadd.f32 %v2350_v59, %v433_v2  ;;  %v2857_v61 = vpop.f32.mrb[21].mxu1 }
0x1ce1   : > { %v2537_v62 = vmul.f32 -1.442695, %v2351_v60 }
0x1ce3   : > { %3064 = vpow2.f32 %v2537_v62 }
0x1ced   : > { %v3065_v7 = vpop.eup %3064 }
0x1cee   : > { %v2357_v63 = vadd.f32 1.0, %v3065_v7 }
0x1cf0   : > { %3066 = vrcp.f32 %v2357_v63 }
0x1cfa   : > { %v3067_v0 = vpop.eup %3066 }
0x1cfb   : > { %2361 = vst.msk [vmem:[%s362_s13] sm:$0x1] %vm2360_vm2, %v3067_v0 }
0x1cfc   : > { %3081 = shalt.err (!%p3078_p3)
}
0x1cfd   : > { %s3082_s12 = scalar_lea.hbm %s3739_s22, 16  ;;  %s3086_s17 = scalar_lea.hbm %s3789_s8, 32 }
0x1cfe   : > { %p3083_p4 = scmp.ne.s32.totalorder %s3739_s22, %s3082_s12  ;;  %p3087_p9 = scmp.lt.u32.totalorder %s3739_s22, %s3789_s8 }
0x1cff   : > { %p3088_p10 = scmp.lt.u32.totalorder %s3086_s17, %s3082_s12  ;;  %p3090_p12 = scmp.lt.u32.totalorder %s3082_s12, %s3739_s22 }
0x1d00   : > { %p3084_p7 = pnand %p3083_p4, %p3223_p5 }
0x1d01   : > { %p3089_p11 = por %p3088_p10, %p3087_p9 }
0x1d02   : > { %p3085_p8 = pneg %p3084_p7 }
0x1d03   : > { %p3091_p13 = por %p3090_p12, %p3089_p11 }
0x1d05   : > { %p3092_p0 = pnand %p3091_p13, %p3085_p8 }
0x1d07   : > { %3095 = shalt.err (!%p3092_p0)
}
0x1d08   : > { %2961 = dma.vmem_to_hbm [thread:$0]  (%p3223_p5), %s3741_s10, 16, %s3739_s22, %s2363_s23  }
0x1d09 PF: > { %p2967_p1 = scmp.ge.s32.totalorder %s3130_s30, 2  ;;  %s2387_s21 = sand.u32 1, %s3118_s27  }
0x1d0a   : > { %s2388_s19 = scalar_lea.sflag [#allocation3], %s2387_s21 }
0x1d0b   : > { %p2964_p2 = pnand %p2967_p1, %p3227_p6 }
0x1d0d   : > { %3113 = dma.done.wait (!%p2964_p2), %s2388_s19, 16  }
0x1d0e   : > { %3115 = vsyncadd (!%p2964_p2), %s2388_s19, 4294967280  ;;  %p18_p3 = scmp.ge.s32.totalorder %s3210_s11, 4   ;;  %s3792_s27 = smov %s3122_s28 }
0x1d0f   : > { %s3793_s28 = smov %s3126_s29  ;;  %s3794_s29 = smov %s3221_s14 }
0x1d10   : > { %s3795_s30 = smov %s3210_s11  ;;  %20 = sbr.rel (!%p18_p3) target bundleno = 3 (0x3), region = 102 }
0x1d17   :  { %2392 = vsyncpa [#allocation3], 1 }
0x1d18   :  { %2394 = vsyncpa [#allocation3 + $0x1], 1 }

</bundles_post_ra>
